<compile_context>
chip_gen: v5e
topology: v5e:2x2
jax: 0.10.0
libtpu: 0.0.40
codegen_flags: <defaults>
</compile_context>

<pallas_src>
import functools

import jax
import jax.numpy as jnp
from jax import lax
from jax.experimental import pallas as pl
from jax.experimental.pallas import tpu as pltpu


def _vmem_capacity_bytes() -> int:
    """Per-core VMEM capacity; conservative (v7x) fallback if unavailable."""
    try:
        return int(pltpu.get_tpu_info().vmem_capacity_bytes)
    except Exception:
        return 64 * 1024 * 1024


def _choose_tq(n_pad: int, c: int, vmem_cap: int) -> int:
    """Largest 128-aligned query tile whose full per-step VMEM footprint fits
    in half of the reported VMEM capacity (generation-aware)."""
    budget = vmem_cap // 2
    v_rows = max(c + 1, 8)       # v_aug block rows (ones row appended), >= 8 sublanes
    x_rows = max(c, 8)
    for tq in (1024, 512, 256, 128):
        if n_pad % tq:
            continue
        footprint = (
            2 * v_rows * n_pad * 4        # v_aug resident block (double buffered)
            + 2 * 8 * n_pad * 4           # k row (sublane padded, double buffered)
            + 2 * tq * 128 * 4            # q tile (lane padded, double buffered)
            + 4 * x_rows * tq * 4         # x residual tile + out tile
            + 2 * tq * n_pad * 4          # attn out tile (double buffered)
            + 2 * tq * n_pad * 4          # in-kernel (TQ, N) temps (energy / e)
        )
        if footprint <= budget:
            return tq
    return 128


def _self_attn_kernel(gamma_ref, q_ref, k_ref, v_ref, x_ref,
                      out_ref, attn_ref, *, n_valid, n_pad, c):
    """One (batch b, query-tile qi) grid step.

    gamma_ref : (1,)        SMEM scalar gamma
    q_ref     : (TQ, 1)     query projection for this tile (bias folded in)
    k_ref     : (1, Np)     key projection for all positions (bias folded in)
    v_ref     : (C+1, Np)   value projection (bias folded in) + a ones row
    x_ref     : (C, TQ)     residual slice of the input
    out_ref   : (C, TQ)     gamma * (v @ attn^T) + x   (lane-dense store)
    attn_ref  : (TQ, Np)    softmax(q k^T)             (lane-dense store)
    """
    gamma = gamma_ref[0]

    q_col = q_ref[...]                                              # (TQ, 1)
    k_row = k_ref[...]                                              # (1, Np)
    v_aug = v_ref[...]                                              # (C+1, Np)
    x_tile = x_ref[...]                                             # (C, TQ)

    # --- rank-1 energy: VPU broadcast outer product (no K=1 matmul) --------
    energy = q_col * k_row                                          # (TQ, Np)

    # Row max of a rank-1 matrix from two O(N) reductions of k:
    #   max_j q_i*k_j = q_i*k_max if q_i >= 0 else q_i*k_min.
    # (With padded k columns this still upper-bounds the true row max, so the
    #  exp stays overflow-free.)
    k_max = jnp.max(k_row, axis=-1, keepdims=True)                  # (1, 1)
    k_min = jnp.min(k_row, axis=-1, keepdims=True)                  # (1, 1)
    m = jnp.where(q_col >= 0.0, q_col * k_max, q_col * k_min)       # (TQ, 1)

    e = jnp.exp(energy - m)                                         # (TQ, Np)
    if n_valid != n_pad:
        # Zero the padded key columns so they contribute nothing to the
        # softmax denominator or to attn @ v.
        col = lax.broadcasted_iota(jnp.int32, e.shape, 1)
        e = jnp.where(col < n_valid, e, 0.0)

    # --- MXU: (C+1, Np) x (TQ, Np)^T -> (C+1, TQ) ---------------------------
    # Issues on the unnormalized e (normalize is off the MXU critical path).
    # The appended ones row of v_aug makes row C of the result the softmax
    # denominator, already in lane-dense (1, TQ) form for the output scale.
    o_aug = lax.dot_general(v_aug, e, (((1,), (1,)), ((), ())),
                            preferred_element_type=jnp.float32)     # (C+1, TQ)
    o_t = o_aug[:c, :]                                              # (C, TQ)
    l_row = o_aug[c:c + 1, :]                                       # (1, TQ)

    # --- attention output: per-row (column-form) denominator ----------------
    l_col = jnp.sum(e, axis=-1, keepdims=True)                      # (TQ, 1)
    inv_col = pl.reciprocal(l_col, approx=True)
    inv_col = inv_col * (2.0 - l_col * inv_col)                     # one Newton step
    attn_ref[...] = (e * inv_col).astype(attn_ref.dtype)

    # --- out tile: gamma/l folded into one (1, TQ) row scale -----------------
    inv_row = pl.reciprocal(l_row, approx=True)
    inv_row = inv_row * (2.0 - l_row * inv_row)
    out_ref[...] = (o_t * (gamma * inv_row) + x_tile).astype(out_ref.dtype)


def self_attn_base(x, wq, bq, wk, bk, wv, bv, gamma):
    """x: (B, C, W, H) float32. Returns (out (B,C,W,H), attention (B,N,N))."""
    B, C, W, H = x.shape
    N = W * H
    x_cn = x.reshape(B, C, N)                       # stays (B, C, N): no transpose

    hi = lax.Precision.HIGHEST
    # --- 1x1-conv projections hoisted to XLA (tiny; computed once) ----------
    q = jnp.einsum('c,bcn->bn', wq.reshape(C), x_cn, precision=hi) + bq       # (B, N)
    k = jnp.einsum('c,bcn->bn', wk.reshape(C), x_cn, precision=hi) + bk       # (B, N)
    v = (jnp.einsum('oc,bcn->bon', wv.reshape(C, C), x_cn, precision=hi)
         + bv.reshape(1, C, 1))                                               # (B, C, N)

    # --- pad N to a 128-multiple (masked in-kernel) --------------------------
    n_pad = max(128, ((N + 127) // 128) * 128)
    if n_pad != N:
        pad = n_pad - N
        q = jnp.pad(q, ((0, 0), (0, pad)))
        k = jnp.pad(k, ((0, 0), (0, pad)))
        v = jnp.pad(v, ((0, 0), (0, 0), (0, pad)))
        x_res = jnp.pad(x_cn, ((0, 0), (0, 0), (0, pad)))
    else:
        x_res = x_cn

    q_col = q.reshape(B, n_pad, 1)
    k_row = k.reshape(B, 1, n_pad)
    # Append a ones row: the attn@v matmul then also yields the softmax denom.
    v_aug = jnp.concatenate([v, jnp.ones((B, 1, n_pad), v.dtype)], axis=1)    # (B, C+1, Np)

    vmem_cap = _vmem_capacity_bytes()
    tq = _choose_tq(n_pad, C, vmem_cap)
    # Keep at least 2 grid steps when B == 1 so v7x's 2 TensorCores both work.
    if B * (n_pad // tq) < 2 and tq > 128:
        tq //= 2
    n_q = n_pad // tq

    gamma_s = gamma.reshape(1).astype(jnp.float32)
    kernel = functools.partial(_self_attn_kernel, n_valid=N, n_pad=n_pad, c=C)

    out_cn, attn_p = pl.pallas_call(
        kernel,
        out_shape=(jax.ShapeDtypeStruct((B, C, n_pad), x.dtype),
                   jax.ShapeDtypeStruct((B, n_pad, n_pad), jnp.float32)),
        grid=(B, n_q),
        in_specs=[
            pl.BlockSpec(memory_space=pltpu.MemorySpace.SMEM),              # gamma
            pl.BlockSpec((None, tq, 1), lambda b, qi: (b, qi, 0)),          # q tile
            pl.BlockSpec((None, 1, n_pad), lambda b, qi: (b, 0, 0)),        # k row
            pl.BlockSpec((None, C + 1, n_pad), lambda b, qi: (b, 0, 0)),    # v (+ ones)
            pl.BlockSpec((None, C, tq), lambda b, qi: (b, 0, qi)),          # x residual
        ],
        out_specs=(pl.BlockSpec((None, C, tq), lambda b, qi: (b, 0, qi)),
                   pl.BlockSpec((None, tq, n_pad), lambda b, qi: (b, qi, 0))),
        compiler_params=pltpu.CompilerParams(
            dimension_semantics=("parallel", "parallel"),
            vmem_limit_bytes=(vmem_cap * 3) // 4,
        ),
    )(gamma_s, q_col, k_row, v_aug, x_res)

    if n_pad != N:
        out_cn = out_cn[:, :, :N]
        attn_p = attn_p[:, :N, :N]
    out = out_cn.reshape(B, C, W, H)
    return out, attn_p


def _reference(x, wq, bq, wk, bk, wv, bv, gamma):
    """Pure-JAX reference mirroring the PyTorch forward (sanity check)."""
    B, C, W, H = x.shape
    N = W * H
    hi = lax.Precision.HIGHEST
    xf = x.reshape(B, C, N)
    q = jnp.einsum('oc,bcn->bon', wq.reshape(1, C), xf, precision=hi) + bq.reshape(1, 1, 1)
    k = jnp.einsum('oc,bcn->bon', wk.reshape(1, C), xf, precision=hi) + bk.reshape(1, 1, 1)
    v = jnp.einsum('oc,bcn->bon', wv.reshape(C, C), xf, precision=hi) + bv.reshape(1, C, 1)
    energy = jnp.einsum('bqn,bqm->bnm', q, k, precision=hi)                   # (B, N, N)
    attn = jax.nn.softmax(energy, axis=-1)
    out = jnp.einsum('bcm,bnm->bcn', v, attn, precision=hi).reshape(B, C, W, H)
    out = gamma.reshape(()) * out + x
    return out, attn


if __name__ == "__main__":
    key = jax.random.PRNGKey(0)
    B, C, W, H = 2, 4, 16, 16

    k1, k2, k3, k4, k5, k6, k7 = jax.random.split(key, 7)
    x = jax.random.normal(k1, (B, C, W, H), dtype=jnp.float32)

    # Parameter shapes match nn.Conv2d 1x1 weights/biases of the module.
    wq = jax.random.normal(k2, (1, C, 1, 1), dtype=jnp.float32) * 0.2
    bq = jax.random.normal(k3, (1,), dtype=jnp.float32) * 0.1
    wk = jax.random.normal(k4, (1, C, 1, 1), dtype=jnp.float32) * 0.2
    bk = jax.random.normal(k5, (1,), dtype=jnp.float32) * 0.1
    wv = jax.random.normal(k6, (C, C, 1, 1), dtype=jnp.float32) * 0.2
    bv = jax.random.normal(k7, (C,), dtype=jnp.float32) * 0.1
    # PyTorch inits gamma to 0; use 0.5 so the attention path actually
    # contributes to the output of this synthetic check.
    gamma = jnp.array([0.5], dtype=jnp.float32)

    out, attn = jax.jit(self_attn_base)(x, wq, bq, wk, bk, wv, bv, gamma)
    out, attn = jax.block_until_ready(out), jax.block_until_ready(attn)

    out_ref, attn_ref = _reference(x, wq, bq, wk, bk, wv, bv, gamma)
    assert out.shape == (B, C, W, H) and attn.shape == (B, W * H, W * H)
    assert jnp.allclose(attn, attn_ref, atol=1e-5, rtol=1e-4), \
        float(jnp.max(jnp.abs(attn - attn_ref)))
    assert jnp.allclose(out, out_ref, atol=1e-4, rtol=1e-4), \
        float(jnp.max(jnp.abs(out - out_ref)))

    print("KERNEL_OK")
</pallas_src>

<mosaic_0001>
module attributes {stable_mosaic.version = 11 : i64} {
  func.func @_self_attn_kernel(%arg0: i32, %arg1: i32, %arg2: memref<1xf32, #tpu.memory_space<smem>>, %arg3: memref<1x256x1xf32, #tpu.memory_space<vmem>>, %arg4: memref<1x1x256xf32, #tpu.memory_space<vmem>>, %arg5: memref<1x5x256xf32, #tpu.memory_space<vmem>>, %arg6: memref<1x4x256xf32, #tpu.memory_space<vmem>>, %arg7: memref<1x4x256xf32, #tpu.memory_space<vmem>>, %arg8: memref<1x256x256xf32, #tpu.memory_space<vmem>>) attributes {dimension_semantics = [#tpu.dimension_semantics<parallel>, #tpu.dimension_semantics<parallel>], iteration_bounds = array<i64: 2, 1>, scalar_prefetch = 0 : i64, scratch_operands = 0 : i64, tpu.core_type = #tpu.core_type<tc>, window_params = [{transform_indices = @transform_0, window_bounds = array<i64: 1>}, {transform_indices = @transform_1, window_bounds = array<i64: 1, 256, 1>}, {transform_indices = @transform_2, window_bounds = array<i64: 1, 1, 256>}, {transform_indices = @transform_3, window_bounds = array<i64: 1, 5, 256>}, {transform_indices = @transform_4, window_bounds = array<i64: 1, 4, 256>}, {transform_indices = @transform_5, window_bounds = array<i64: 1, 4, 256>}, {transform_indices = @transform_6, window_bounds = array<i64: 1, 256, 256>}]} {
    %c0 = arith.constant 0 : index
    %0 = memref.load %arg2[%c0] : memref<1xf32, #tpu.memory_space<smem>>
    %c0_0 = arith.constant 0 : index
    %c0_1 = arith.constant 0 : index
    %c0_2 = arith.constant 0 : index
    %1 = vector.load %arg3[%c0_0, %c0_1, %c0_2] : memref<1x256x1xf32, #tpu.memory_space<vmem>>, vector<1x256x1xf32>
    %2 = vector.shape_cast %1 : vector<1x256x1xf32> to vector<256x1xf32>
    %c0_3 = arith.constant 0 : index
    %c0_4 = arith.constant 0 : index
    %c0_5 = arith.constant 0 : index
    %3 = vector.load %arg4[%c0_3, %c0_4, %c0_5] : memref<1x1x256xf32, #tpu.memory_space<vmem>>, vector<1x1x256xf32>
    %4 = vector.shape_cast %3 : vector<1x1x256xf32> to vector<1x256xf32>
    %c0_6 = arith.constant 0 : index
    %c0_7 = arith.constant 0 : index
    %c0_8 = arith.constant 0 : index
    %5 = vector.load %arg5[%c0_6, %c0_7, %c0_8] : memref<1x5x256xf32, #tpu.memory_space<vmem>>, vector<1x5x256xf32>
    %6 = vector.shape_cast %5 : vector<1x5x256xf32> to vector<5x256xf32>
    %c0_9 = arith.constant 0 : index
    %c0_10 = arith.constant 0 : index
    %c0_11 = arith.constant 0 : index
    %7 = vector.load %arg6[%c0_9, %c0_10, %c0_11] : memref<1x4x256xf32, #tpu.memory_space<vmem>>, vector<1x4x256xf32>
    %8 = vector.shape_cast %7 : vector<1x4x256xf32> to vector<4x256xf32>
    %9 = vector.broadcast %2 : vector<256x1xf32> to vector<256x256xf32>
    %10 = vector.broadcast %4 : vector<1x256xf32> to vector<256x256xf32>
    %11 = arith.mulf %9, %10 : vector<256x256xf32>
    %cst = arith.constant dense<0xFF800000> : vector<1xf32>
    %12 = vector.multi_reduction <maximumf>, %4, %cst [1] : vector<1x256xf32> to vector<1xf32>
    %13 = vector.shape_cast %12 : vector<1xf32> to vector<1x1xf32>
    %cst_12 = arith.constant dense<0x7F800000> : vector<1xf32>
    %14 = vector.multi_reduction <minimumf>, %4, %cst_12 [1] : vector<1x256xf32> to vector<1xf32>
    %15 = vector.shape_cast %14 : vector<1xf32> to vector<1x1xf32>
    %cst_13 = arith.constant 0.000000e+00 : f32
    %16 = vector.broadcast %cst_13 : f32 to vector<256x1xf32>
    %17 = arith.cmpf oge, %2, %16 : vector<256x1xf32>
    %18 = vector.broadcast %13 : vector<1x1xf32> to vector<256x1xf32>
    %19 = arith.mulf %2, %18 : vector<256x1xf32>
    %20 = vector.broadcast %15 : vector<1x1xf32> to vector<256x1xf32>
    %21 = arith.mulf %2, %20 : vector<256x1xf32>
    %22 = arith.select %17, %19, %21 : vector<256x1xi1>, vector<256x1xf32>
    %23 = vector.broadcast %22 : vector<256x1xf32> to vector<256x256xf32>
    %24 = arith.subf %11, %23 : vector<256x256xf32>
    %25 = math.exp %24 : vector<256x256xf32>
    %cst_14 = arith.constant dense<0.000000e+00> : vector<5x256xf32>
    %26 = tpu.matmul %6, %25, %cst_14 {dimension_numbers = #tpu.dot_dimension_numbers<[1], [1], [0], [0], [0, 0, 1, 0], [], []>} : vector<5x256xf32>, vector<256x256xf32>, vector<5x256xf32> -> vector<5x256xf32>
    %27 = vector.extract_strided_slice %26 {offsets = [0, 0], sizes = [4, 256], strides = [1, 1]} : vector<5x256xf32> to vector<4x256xf32>
    %28 = vector.extract_strided_slice %26 {offsets = [4, 0], sizes = [1, 256], strides = [1, 1]} : vector<5x256xf32> to vector<1x256xf32>
    %cst_15 = arith.constant dense<0.000000e+00> : vector<256xf32>
    %29 = vector.multi_reduction <add>, %25, %cst_15 [1] : vector<256x256xf32> to vector<256xf32>
    %30 = vector.shape_cast %29 : vector<256xf32> to vector<256x1xf32>
    %31 = tpu.reciprocal %30 {approx = true} : vector<256x1xf32> -> vector<256x1xf32>
    %32 = arith.mulf %30, %31 : vector<256x1xf32>
    %cst_16 = arith.constant 2.000000e+00 : f32
    %33 = vector.broadcast %cst_16 : f32 to vector<256x1xf32>
    %34 = arith.subf %33, %32 : vector<256x1xf32>
    %35 = arith.mulf %31, %34 : vector<256x1xf32>
    %36 = vector.broadcast %35 : vector<256x1xf32> to vector<256x256xf32>
    %37 = arith.mulf %25, %36 : vector<256x256xf32>
    %c0_17 = arith.constant 0 : index
    %c0_18 = arith.constant 0 : index
    %c0_19 = arith.constant 0 : index
    %38 = vector.load %arg8[%c0_17, %c0_18, %c0_19] : memref<1x256x256xf32, #tpu.memory_space<vmem>>, vector<1x256x256xf32>
    %39 = vector.shape_cast %38 : vector<1x256x256xf32> to vector<256x256xf32>
    %40 = vector.shape_cast %37 : vector<256x256xf32> to vector<1x256x256xf32>
    tpu.vector_store %arg8[%c0_17, %c0_18, %c0_19], %40 {strides = array<i32>} : memref<1x256x256xf32, #tpu.memory_space<vmem>>, vector<1x256x256xf32>,
    %41 = tpu.reciprocal %28 {approx = true} : vector<1x256xf32> -> vector<1x256xf32>
    %42 = arith.mulf %28, %41 : vector<1x256xf32>
    %cst_20 = arith.constant 2.000000e+00 : f32
    %43 = vector.broadcast %cst_20 : f32 to vector<1x256xf32>
    %44 = arith.subf %43, %42 : vector<1x256xf32>
    %45 = arith.mulf %41, %44 : vector<1x256xf32>
    %46 = vector.broadcast %0 : f32 to vector<1x256xf32>
    %47 = arith.mulf %46, %45 : vector<1x256xf32>
    %48 = vector.broadcast %47 : vector<1x256xf32> to vector<4x256xf32>
    %49 = arith.mulf %27, %48 : vector<4x256xf32>
    %50 = arith.addf %49, %8 : vector<4x256xf32>
    %c0_21 = arith.constant 0 : index
    %c0_22 = arith.constant 0 : index
    %c0_23 = arith.constant 0 : index
    %51 = vector.load %arg7[%c0_21, %c0_22, %c0_23] : memref<1x4x256xf32, #tpu.memory_space<vmem>>, vector<1x4x256xf32>
    %52 = vector.shape_cast %51 : vector<1x4x256xf32> to vector<4x256xf32>
    %53 = vector.shape_cast %50 : vector<4x256xf32> to vector<1x4x256xf32>
    tpu.vector_store %arg7[%c0_21, %c0_22, %c0_23], %53 {strides = array<i32>} : memref<1x4x256xf32, #tpu.memory_space<vmem>>, vector<1x4x256xf32>,
    return
  }
  func.func @transform_0(%arg0: i32, %arg1: i32) -> i32 {
    %c0_i32 = arith.constant 0 : i32
    %c0_i32_0 = arith.constant 0 : i32
    return %c0_i32 : i32
  }
  func.func @transform_1(%arg0: i32, %arg1: i32) -> (i32, i32, i32) {
    %c0_i32 = arith.constant 0 : i32
    %c0_i32_0 = arith.constant 0 : i32
    return %arg0, %arg1, %c0_i32 : i32, i32, i32
  }
  func.func @transform_2(%arg0: i32, %arg1: i32) -> (i32, i32, i32) {
    %c0_i32 = arith.constant 0 : i32
    %c0_i32_0 = arith.constant 0 : i32
    %c0_i32_1 = arith.constant 0 : i32
    return %arg0, %c0_i32, %c0_i32_0 : i32, i32, i32
  }
  func.func @transform_3(%arg0: i32, %arg1: i32) -> (i32, i32, i32) {
    %c0_i32 = arith.constant 0 : i32
    %c0_i32_0 = arith.constant 0 : i32
    %c0_i32_1 = arith.constant 0 : i32
    return %arg0, %c0_i32, %c0_i32_0 : i32, i32, i32
  }
  func.func @transform_4(%arg0: i32, %arg1: i32) -> (i32, i32, i32) {
    %c0_i32 = arith.constant 0 : i32
    %c0_i32_0 = arith.constant 0 : i32
    return %arg0, %c0_i32, %arg1 : i32, i32, i32
  }
  func.func @transform_5(%arg0: i32, %arg1: i32) -> (i32, i32, i32) {
    %c0_i32 = arith.constant 0 : i32
    %c0_i32_0 = arith.constant 0 : i32
    return %arg0, %c0_i32, %arg1 : i32, i32, i32
  }
  func.func @transform_6(%arg0: i32, %arg1: i32) -> (i32, i32, i32) {
    %c0_i32 = arith.constant 0 : i32
    %c0_i32_0 = arith.constant 0 : i32
    return %arg0, %arg1, %c0_i32 : i32, i32, i32
  }
}

</mosaic_0001>

<bundles_post_ra>
// kernel: self_attn_base.1
= control target key start
LH: loop header
LB: loop body
LE: loop exit
PB: predicated region body
PF: predicated region fallthrough
CT: control target
= control target key end

     0   :  { %s3261_s0 = inlined_call_operand.<no memory space> [shape: f32[1], index: 0, kind: input, shape index: {}]   ;;  %s3262_s1 = inlined_call_operand.vmem [shape: f32[2,256,1], index: 1, kind: input, shape index: {}]   ;;  %s3263_s2 = inlined_call_operand.vmem [shape: f32[2,1,256], index: 2, kind: input, shape index: {}]   ;;  %s3264_s3 = inlined_call_operand.vmem [shape: f32[2,5,256], index: 3, kind: input, shape index: {}]   ;;  %s3265_s4 = inlined_call_operand.vmem [shape: f32[2,4,256], index: 4, kind: input, shape index: {}]   ;;  %s3266_s5 = inlined_call_operand.vmem [shape: f32[2,4,256], index: 5, kind: output, shape index: {0}]   ;;  %s3267_s6 = inlined_call_operand.hbm [shape: f32[2,256,256], index: 6, kind: output, shape index: {1}]  }
   0x1   :  { %12 = sst [smem:[#allocation2]] %s3261_s0 }
   0x2   :  { %13 = vsyncpa [#allocation4], 0 }
   0x3   :  { %15 = vsyncpa [#allocation4 + $0x1], 0  ;;  %s2193_s23 = smov 0   ;;  %s2195_s24 = smov 0  }
   0x4   :  { %s2197_s25 = smov 0   ;;  %s2199_s26 = smov 0  }
   0x5   :  { %s2201_s27 = smov 0   ;;  %s2203_s28 = smov 0  }
   0x6 LB: > { %s1790_s0 = sadd.s32 4294967295, %s2150_s28   ;;  %s1791_s29 = sadd.s32 4294967294, %s2150_s28   ;;  %s2150_s28 = sphi %s2203_s28, %s21_s28   ;;  %s2146_s27 = sphi %s2201_s27, %s3337_s27   ;;  %s2142_s26 = sphi %s2199_s26, %s3336_s26   ;;  %s2138_s25 = sphi %s2197_s25, %s3335_s25   ;;  %s2134_s24 = sphi %s2195_s24, %s3334_s24   ;;  %s2130_s23 = sphi %s2193_s23, %s3333_s23  }
   0x7   : > { %s33_s30 = sadd.s32 1, %s2146_s27  ;;  %s199_s7 = sadd.s32 1, %s2138_s25 }
   0x8   : > { %p35_p0 = scmp.ge.s32.totalorder %s33_s30, 2  ;;  %p209_p1 = scmp.ne.s32.totalorder %s2138_s25, %s2134_s24 }
   0x9   : > { %p210_p2 = scmp.eq.s32.totalorder %s1790_s0, 1  ;;  %p215_p3 = scmp.ne.s32.totalorder %s2134_s24, %s2130_s23 }
   0xa   : > { %s3339_s30 = smov (%p35_p0, %s33_s30), 0  ;;  %p216_p5 = scmp.eq.s32.totalorder %s1791_s29, 1 }
   0xb   : > { %p2233_p4 = por %p210_p2, %p209_p1  ;;  %s194_s9 = ssub.s32 %s2146_s27, %s3339_s30 }
   0xc   : > { %p1794_p6 = scmp.ge.s32.totalorder %s2150_s28, 1  ;;  %p197_p7 = scmp.eq.s32.totalorder %s194_s9, 0 }
   0xd   : > { %p2240_p8 = por %p216_p5, %p215_p3  ;;  %p278_p9 = scmp.lt.s32.totalorder %s2150_s28, 3 }
   0xe   : > { %s2246_s11 = scalar_select %p197_p7, %s2138_s25, %s199_s7  }
   0xf   : > { %p279_p10 = pnand %p1794_p6, %p278_p9 }
  0x11   : > { %282 = sbr.rel (%p279_p10) target bundleno = 590 (0x24e), region = 40 }
  0x16   : > { %p340_p11 = scmp.lt.s32.totalorder %s2142_s26, 1  ;;  %v2152_v0 = vmov 0   ;;  %vm645_vm0 = vcmask 1040384   ;;  %s336_s7 = sand.u32 1, %s2134_s24  }
  0x17   : > { %1873 = vset.pattern.permute.xlu1 %v2152_v0  ;;  %1875 = vset.pattern.permute.xlu0 %v2152_v0  ;;  %s1795_s9 = sshll.u32 %s336_s7, 9  ;;  %s379_s18 = sld [smem:[#allocation2]] }
  0x18   : > { %s2250_s12 = scalar_select %p340_p11, %s2142_s26, 1  ;;  %1874 = vset.pattern.permute.xlu2 %v2152_v0 }
  0x19   : > { %s2092_s19 = scalar_lea.hbm %s3267_s6, 1024 }
  0x1a   : > { %s1810_s13 = sshll.u32 %s2250_s12, 8  ;;  %s1798_s14 = sshll.u32 %s2250_s12, 1 }
  0x1b   : > { %s2257_s17 = scalar_lea.vmem %s3262_s1, %s1810_s13  ;;  %s352_s20 = scalar_lea.vmem %s3263_s2, %s1798_s14 }
  0x1c   : > { %v2263_v1 = vld [vmem:[%s2257_s17 + $0x10] sm:$0xff]  ;;  %v412_v2 = vld [vmem:[%s352_s20] sm:$0x3]  ;;  %v2275_v11 = vld [vmem:[%s2257_s17 + $0x18] sm:$0xff]  ;;  %s1811_s21 = sshll.u32 %s2250_s12, 4  ;;  %s3073_s13 = scalar_lea.vmem [#allocation3], %s1795_s9 }
  0x1d   : > { %v2265_v3 = vperm.slane %v412_v2, 0  ;;  %v2267_v4 = vperm.slane %v412_v2, 1  ;;  %428 = vperm.xlu1 %1873, %v2263_v1   ;;  %v2279_v12 = vld [vmem:[%s2257_s17 + $0x38] sm:$0xff]  ;;  %v2283_v13 = vld [vmem:[%s2257_s17 + $0x50] sm:$0xff]  ;;  %v2286_v14 = vld [vmem:[%s2257_s17] sm:$0xff]  ;;  %vm658_vm9 = vcmp.ge.f32.partialorder %v2263_v1, 0.0  ;;  %s357_s29 = scalar_lea.vmem %s3264_s3, %s1811_s21 }
  0x1e   : > { %v2291_v15 = vld [vmem:[%s2257_s17 + $0x20] sm:$0xff]  ;;  %v2294_v16 = vld [vmem:[%s2257_s17 + $0x68] sm:$0xff]  ;;  %v2310_v20 = vld [vmem:[%s2257_s17 + $0x30] sm:$0xff]  ;;  %vm656_vm3 = vcmp.ge.f32.partialorder %v2286_v14, 0.0  ;;  %vm666_vm11 = vcmp.ge.f32.partialorder %v2283_v13, 0.0  ;;  %vm659_vm12 = vcmp.ge.f32.partialorder %v2275_v11, 0.0 }
  0x1f   : > { %v651_v5 = vsel %vm645_vm0, %v2265_v3, inf  ;;  %v652_v6 = vsel %vm645_vm0, %v2267_v4, inf  ;;  %v646_v7 = vsel %vm645_vm0, %v2265_v3, -inf  ;;  %v647_v8 = vsel %vm645_vm0, %v2267_v4, -inf  ;;  %v2298_v17 = vld [vmem:[%s2257_s17 + $0x8] sm:$0xff]  ;;  %v2306_v19 = vld [vmem:[%s2257_s17 + $0x80] sm:$0xff] }
  0x20   : > { %v653_v9 = vmin.f32 %v651_v5, %v652_v6  ;;  %v648_v10 = vmax.f32 %v646_v7, %v647_v8  ;;  %v2303_v18 = vld [vmem:[%s2257_s17 + $0x28] sm:$0xff]  ;;  %v2315_v21 = vld [vmem:[%s2257_s17 + $0x40] sm:$0xff]  ;;  %v2318_v22 = vld [vmem:[%s2257_s17 + $0x98] sm:$0xff]  ;;  %vm669_vm5 = vcmp.ge.f32.partialorder %v2294_v16, 0.0  ;;  %vm657_vm6 = vcmp.ge.f32.partialorder %v2298_v17, 0.0  ;;  %s1812_s14 = sshll.u32 %s2250_s12, 3 }
  0x21   : > { %v2322_v23 = vld [vmem:[%s2257_s17 + $0x48] sm:$0xff]  ;;  %v2327_v24 = vld [vmem:[%s2257_s17 + $0x58] sm:$0xff]  ;;  %v2330_v25 = vld [vmem:[%s2257_s17 + $0xb0] sm:$0xff]  ;;  %vm672_vm13 = vcmp.ge.f32.partialorder %v2306_v19, 0.0  ;;  %s376_s21 = scalar_lea.vmem %s3266_s5, %s1812_s14  ;;  %s1814_s12 = sshll.u32 %s2142_s26, 9 }
  0x22   : > { %654 = vmin.xlane.f32.xlu0 %v653_v9  ;;  %649 = vmax.xlane.f32.xlu2 %v648_v10  ;;  %v2334_v26 = vld [vmem:[%s2257_s17 + $0x60] sm:$0xff]  ;;  %v2339_v27 = vld [vmem:[%s2257_s17 + $0x70] sm:$0xff]  ;;  %v2342_v28 = vld [vmem:[%s2257_s17 + $0xc8] sm:$0xff]  ;;  %vm667_vm15 = vcmp.ge.f32.partialorder %v2327_v24, 0.0  ;;  %s1629_s9 = sshll.u32 %s3073_s13, 4  ;;  %s1610_s26 = scalar_lea.sflag [#allocation4], %s336_s7  ;;  %s1630_s9 = int_to_ptr.vmem [resolvable:$true] %s1629_s9 }
  0x23   : > { %v395_v29 = vld [vmem:[%s2257_s17 + $0x78] sm:$0xff]  ;;  %v2348_v30 = vld [vmem:[%s2257_s17 + $0x88] sm:$0xff]  ;;  %v408_v31 = vld [vmem:[%s2257_s17 + $0xe0] sm:$0xff]  ;;  %vm668_vm7 = vcmp.ge.f32.partialorder %v2334_v26, 0.0  ;;  %vm681_vm10 = vcmp.ge.f32.partialorder %v2342_v28, 0.0 }
  0x24   : > { %v2353_v32 = vld [vmem:[%s2257_s17 + $0x90] sm:$0xff]  ;;  %v2357_v33 = vld [vmem:[%s2257_s17 + $0xa0] sm:$0xff]  ;;  %v411_v34 = vld [vmem:[%s2257_s17 + $0xf8] sm:$0xff]  ;;  %vm671_vm2 = vcmp.ge.f32.partialorder %v395_v29, 0.0  ;;  %vm684_vm4 = vcmp.ge.f32.partialorder %v408_v31, 0.0 }
  0x25   : > { %433 = vperm.xlu1 %1873, %v2275_v11   ;;  %v2362_v35 = vld [vmem:[%s2257_s17 + $0xa8] sm:$0xff]  ;;  %v2366_v36 = vld [vmem:[%s2257_s17 + $0xb8] sm:$0xff]  ;;  %v2370_v37 = vld [vmem:[%s2257_s17 + $0xc0] sm:$0xff]  ;;  %vm687_vm1 = vcmp.ge.f32.partialorder %v411_v34, 0.0 }
  0x26   : > { %v2374_v38 = vld [vmem:[%s2257_s17 + $0xd0] sm:$0xff]  ;;  %v2378_v39 = vld [vmem:[%s2257_s17 + $0xd8] sm:$0xff]  ;;  %v2382_v40 = vld [vmem:[%s2257_s17 + $0xe8] sm:$0xff]  ;;  %vm680_vm0 = vcmp.ge.f32.partialorder %v2370_v37, 0.0 }
  0x27   : > { %v2386_v41 = vld [vmem:[%s2257_s17 + $0xf0] sm:$0xff]  ;;  %vm682_vm8 = vcmp.ge.f32.partialorder %v2374_v38, 0.0  ;;  %vm683_vm14 = vcmp.ge.f32.partialorder %v2378_v39, 0.0  ;;  %s366_s17 = scalar_lea.vmem %s3265_s4, %s1812_s14 }
  0x2d   : > { %453 = vperm.xlu1 %1873, %v2279_v12  }
  0x35   : > { %468 = vperm.xlu1 %1873, %v2283_v13  }
  0x36   : > { %418 = vperm.xlu0 %1875, %v2286_v14  }
  0x3a   : > { %438 = vperm.xlu2 %1874, %v2291_v15  }
  0x3d   : > { %483 = vperm.xlu1 %1873, %v2294_v16  }
  0x3e   : > { %423 = vperm.xlu0 %1875, %v2298_v17  }
  0x42   : > { %443 = vperm.xlu2 %1874, %v2303_v18  }
  0x45   : > { %498 = vperm.xlu1 %1873, %v2306_v19  }
  0x46   : > { %448 = vperm.xlu0 %1875, %v2310_v20  }
  0x4a   : > { %458 = vperm.xlu2 %1874, %v2315_v21  }
  0x4d   : > { %513 = vperm.xlu1 %1873, %v2318_v22  }
  0x4e   : > { %463 = vperm.xlu0 %1875, %v2322_v23  }
  0x52   : > { %473 = vperm.xlu2 %1874, %v2327_v24  }
  0x55   : > { %528 = vperm.xlu1 %1873, %v2330_v25  }
  0x56   : > { %478 = vperm.xlu0 %1875, %v2334_v26  }
  0x5a   : > { %488 = vperm.xlu2 %1874, %v2339_v27  }
  0x5d   : > { %543 = vperm.xlu1 %1873, %v2342_v28  }
  0x5e   : > { %493 = vperm.xlu0 %1875, %v395_v29  }
  0x62   : > { %503 = vperm.xlu2 %1874, %v2348_v30  }
  0x65   : > { %558 = vperm.xlu1 %1873, %v408_v31  }
  0x66   : > { %508 = vperm.xlu0 %1875, %v2353_v32  }
  0x6a   : > { %518 = vperm.xlu2 %1874, %v2357_v33  }
  0x6d   : > { %573 = vperm.xlu1 %1873, %v411_v34  }
  0x6e   : > { %523 = vperm.xlu0 %1875, %v2362_v35  }
  0x72   : > { %533 = vperm.xlu2 %1874, %v2366_v36  }
  0x76   : > { %538 = vperm.xlu0 %1875, %v2370_v37  }
  0x7a   : > { %548 = vperm.xlu2 %1874, %v2374_v38  }
  0x7e   : > { %553 = vperm.xlu0 %1875, %v2378_v39  }
  0x82   : > { %563 = vperm.xlu2 %1874, %v2382_v40  }
  0x86   : > { %568 = vperm.xlu0 %1875, %v2386_v41  }
  0x8f   : > { %v2389_v42 = vpop.permute.xlu1 %428 }
  0x95   : > { %v655_v43 = vpop.xlane.xlu0 %654  ;;  %v650_v44 = vpop.xlane.xlu2 %649 }
  0x96   : > { %v2391_v45 = vperm.slane %v655_v43, 0  ;;  %v2393_v46 = vperm.slane %v650_v44, 0 }
  0x97   : > { %v2395_v47 = vpop.permute.xlu1 %433 }
  0x98   : > { %v720_v48 = vmul.f32 %v2393_v46, %v411_v34  ;;  %v753_v49 = vmul.f32 %v2391_v45, %v411_v34  ;;  %v704_v50 = vmul.f32 %v2393_v46, %v395_v29  ;;  %v737_v51 = vmul.f32 %v2391_v45, %v395_v29 }
  0x99   : > { %v689_v52 = vmul.f32 %v2393_v46, %v2286_v14  ;;  %v722_v53 = vmul.f32 %v2391_v45, %v2286_v14  ;;  %v717_v58 = vmul.f32 %v2393_v46, %v408_v31  ;;  %v750_v59 = vmul.f32 %v2391_v45, %v408_v31 }
  0x9a   : > { %v785_v54 = vsel %vm687_vm1, %v720_v48, %v753_v49  ;;  %v769_v55 = vsel %vm671_vm2, %v704_v50, %v737_v51  ;;  %v702_v60 = vmul.f32 %v2393_v46, %v2294_v16  ;;  %v735_v61 = vmul.f32 %v2391_v45, %v2294_v16 }
  0x9b   : > { %943 = vperm.xlu2 %1874, %v785_v54   ;;  %v754_v56 = vsel %vm656_vm3, %v689_v52, %v722_v53  ;;  %863 = vperm.xlu0 %1875, %v769_v55   ;;  %v690_v62 = vmul.f32 %v2393_v46, %v2298_v17  ;;  %v723_v63 = vmul.f32 %v2391_v45, %v2298_v17  ;;  %vm664_vm1 = vcmp.ge.f32.partialorder %v2315_v21, 0.0 }
  0x9c   : > { %788 = vperm.xlu1 %1873, %v754_v56   ;;  %v782_v2 = vsel %vm684_vm4, %v717_v58, %v750_v59  ;;  %v767_v5 = vsel %vm669_vm5, %v702_v60, %v735_v61  ;;  %v701_v8 = vmul.f32 %v2393_v46, %v2334_v26  ;;  %v734_v9 = vmul.f32 %v2391_v45, %v2334_v26 }
  0x9d   : > { %v2406_v57 = vpop.permute.xlu2 %438  ;;  %v755_v6 = vsel %vm657_vm6, %v690_v62, %v723_v63  ;;  %v715_v10 = vmul.f32 %v2393_v46, %v2374_v38  ;;  %v748_v14 = vmul.f32 %v2391_v45, %v2374_v38  ;;  %v691_v16 = vmul.f32 %v2393_v46, %v2263_v1 }
  0x9e   : > { %v724_v17 = vmul.f32 %v2391_v45, %v2263_v1  ;;  %v766_v26 = vsel %vm668_vm7, %v701_v8, %v734_v9  ;;  %v714_v38 = vmul.f32 %v2393_v46, %v2342_v28  ;;  %v747_v1 = vmul.f32 %v2391_v45, %v2342_v28 }
  0x9f   : > { %v2420_v0 = vpop.permute.xlu1 %453  ;;  %v780_v34 = vsel %vm682_vm8, %v715_v10, %v748_v14  ;;  %v699_v44 = vmul.f32 %v2393_v46, %v2283_v13  ;;  %v732_v48 = vmul.f32 %v2391_v45, %v2283_v13  ;;  %v692_v49 = vmul.f32 %v2393_v46, %v2275_v11 }
  0xa0   : > { %v756_v43 = vsel %vm658_vm9, %v691_v16, %v724_v17  ;;  %v725_v50 = vmul.f32 %v2391_v45, %v2275_v11  ;;  %v705_v52 = vmul.f32 %v2393_v46, %v2306_v19  ;;  %v738_v53 = vmul.f32 %v2391_v45, %v2306_v19 }
  0xa1   : > { %v716_v54 = vmul.f32 %v2393_v46, %v2378_v39  ;;  %vm677_vm2 = vcmp.ge.f32.partialorder %v2362_v35, 0.0  ;;  %vm661_vm3 = vcmp.ge.f32.partialorder %v2303_v18, 0.0  ;;  %v749_v56 = vmul.f32 %v2391_v45, %v2378_v39 }
  0xa2   : > { %v2475_v55 = vsel %vm672_vm13, %v705_v52, %v738_v53  ;;  %v700_v58 = vmul.f32 %v2393_v46, %v2327_v24  ;;  %v733_v59 = vmul.f32 %v2391_v45, %v2327_v24  ;;  %v779_v61 = vsel %vm681_vm10, %v714_v38, %v747_v1 }
  0xa3   : > { %928 = vperm.xlu2 %1874, %v782_v2   ;;  %853 = vperm.xlu0 %1875, %v767_v5   ;;  %v713_v62 = vmul.f32 %v2393_v46, %v2370_v37  ;;  %v746_v19 = vmul.f32 %v2391_v45, %v2370_v37  ;;  %vm673_vm4 = vcmp.ge.f32.partialorder %v2348_v30, 0.0  ;;  %v764_v63 = vsel %vm666_vm11, %v699_v44, %v732_v48 }
  0xa4   : > { %793 = vperm.xlu1 %1873, %v755_v6   ;;  %v757_v2 = vsel %vm659_vm12, %v692_v49, %v725_v50  ;;  %v2498_v5 = vsel %vm683_vm14, %v716_v54, %v749_v56  ;;  %v2502_v28 = vsel %vm667_vm15, %v700_v58, %v733_v59  ;;  %v697_v8 = vmul.f32 %v2393_v46, %v2315_v21 }
  0xa5   : > { %v2422_v7 = vpop.permute.xlu2 %443  ;;  %v2506_v6 = vsel %vm680_vm0, %v713_v62, %v746_v19  ;;  %v730_v13 = vmul.f32 %v2391_v45, %v2315_v21  ;;  %v710_v11 = vmul.f32 %v2393_v46, %v2362_v35  ;;  %v743_v39 = vmul.f32 %v2391_v45, %v2362_v35 }
  0xa6   : > { %v694_v24 = vmul.f32 %v2393_v46, %v2303_v18  ;;  %v727_v37 = vmul.f32 %v2391_v45, %v2303_v18  ;;  %v706_v9 = vmul.f32 %v2393_v46, %v2348_v30  ;;  %v739_v14 = vmul.f32 %v2391_v45, %v2348_v30 }
  0xa7   : > { %v2446_v31 = vpop.permute.xlu1 %468  ;;  %v2524_v10 = vsel %vm664_vm1, %v697_v8, %v730_v13  ;;  %vm665_vm5 = vcmp.ge.f32.partialorder %v2322_v23, 0.0  ;;  %v698_v21 = vmul.f32 %v2393_v46, %v2322_v23  ;;  %v712_v35 = vmul.f32 %v2393_v46, %v2366_v36 }
  0xa8   : > { %v2437_v29 = vpop.permute.xlu0 %418  ;;  %v2547_v38 = vsel %vm673_vm4, %v706_v9, %v739_v14  ;;  %v745_v18 = vmul.f32 %v2391_v45, %v2366_v36  ;;  %v693_v1 = vmul.f32 %v2393_v46, %v2291_v15  ;;  %v726_v44 = vmul.f32 %v2391_v45, %v2291_v15 }
  0xa9   : > { %vm679_vm6 = vcmp.ge.f32.partialorder %v2366_v36, 0.0  ;;  %vm660_vm7 = vcmp.ge.f32.partialorder %v2291_v15, 0.0  ;;  %vm678_vm8 = vcmp.ge.f32.partialorder %v2330_v25, 0.0  ;;  %v711_v52 = vmul.f32 %v2393_v46, %v2330_v25 }
  0xaa   : > { %v777_v30 = vsel %vm679_vm6, %v712_v35, %v745_v18  ;;  %v758_v49 = vsel %vm660_vm7, %v693_v1, %v726_v44  ;;  %v744_v53 = vmul.f32 %v2391_v45, %v2330_v25  ;;  %v696_v15 = vmul.f32 %v2393_v46, %v2279_v12 }
  0xab   : > { %848 = vperm.xlu2 %1874, %v766_v26   ;;  %918 = vperm.xlu0 %1875, %v780_v34   ;;  %v2534_v26 = vsel %vm677_vm2, %v710_v11, %v743_v39  ;;  %v2538_v34 = vsel %vm661_vm3, %v694_v24, %v727_v37  ;;  %v729_v36 = vmul.f32 %v2391_v45, %v2279_v12  ;;  %vm663_vm9 = vcmp.ge.f32.partialorder %v2279_v12, 0.0 }
  0xac   : > { %798 = vperm.xlu1 %1873, %v756_v43   ;;  %v731_v43 = vmul.f32 %v2391_v45, %v2322_v23  ;;  %v719_v56 = vmul.f32 %v2393_v46, %v2386_v41  ;;  %v752_v58 = vmul.f32 %v2391_v45, %v2386_v41  ;;  %vm686_vm10 = vcmp.ge.f32.partialorder %v2386_v41, 0.0 }
  0xad   : > { %v2462_v51 = vpop.permute.xlu2 %458  ;;  %v776_v25 = vsel %vm678_vm8, %v711_v52, %v744_v53  ;;  %vm662_vm11 = vcmp.ge.f32.partialorder %v2310_v20, 0.0  ;;  %v709_v12 = vmul.f32 %v2393_v46, %v2357_v33  ;;  %v742_v41 = vmul.f32 %v2391_v45, %v2357_v33 }
  0xae   : > { %v763_v23 = vsel %vm665_vm5, %v698_v21, %v731_v43  ;;  %v784_v62 = vsel %vm686_vm10, %v719_v56, %v752_v58  ;;  %v718_v8 = vmul.f32 %v2393_v46, %v2382_v40  ;;  %v751_v13 = vmul.f32 %v2391_v45, %v2382_v40 }
  0xaf   : > { %v2528_v16 = vpop.permute.xlu1 %483  ;;  %vm676_vm12 = vcmp.ge.f32.partialorder %v2357_v33, 0.0  ;;  %vm685_vm13 = vcmp.ge.f32.partialorder %v2382_v40, 0.0  ;;  %vm675_vm14 = vcmp.ge.f32.partialorder %v2318_v22, 0.0  ;;  %v708_v14 = vmul.f32 %v2393_v46, %v2318_v22 }
  0xb0   : > { %v2483_v60 = vpop.permute.xlu0 %423  ;;  %v774_v24 = vsel %vm676_vm12, %v709_v12, %v742_v41  ;;  %v783_v37 = vsel %vm685_vm13, %v718_v8, %v751_v13  ;;  %v741_v33 = vmul.f32 %v2391_v45, %v2318_v22  ;;  %v707_v40 = vmul.f32 %v2393_v46, %v2353_v32 }
  0xb1   : > { %v740_v21 = vmul.f32 %v2391_v45, %v2353_v32  ;;  %v703_v43 = vmul.f32 %v2393_v46, %v2339_v27  ;;  %v736_v35 = vmul.f32 %v2391_v45, %v2339_v27  ;;  %vm674_vm15 = vcmp.ge.f32.partialorder %v2353_v32, 0.0 }
  0xb2   : > { %vm670_vm0 = vcmp.ge.f32.partialorder %v2339_v27, 0.0  ;;  %v773_v18 = vsel %vm675_vm14, %v708_v14, %v741_v33  ;;  %v582_v12 = vmul.f32 %v2267_v4, %v2437_v29  ;;  %vm1596_vm1 = vcmask 1043456  }
  0xb3   : > { %913 = vperm.xlu2 %1874, %v779_v61   ;;  %838 = vperm.xlu0 %1875, %v764_v63   ;;  %v761_v61 = vsel %vm663_vm9, %v696_v15, %v729_v36  ;;  %v695_v63 = vmul.f32 %v2393_v46, %v2310_v20  ;;  %v772_v22 = vsel %vm674_vm15, %v707_v40, %v740_v21 }
  0xb4   : > { %803 = vperm.xlu1 %1873, %v757_v2   ;;  %v728_v2 = vmul.f32 %v2391_v45, %v2310_v20  ;;  %v768_v44 = vsel %vm670_vm0, %v703_v43, %v736_v35 }
  0xb5   : > { %v2530_v17 = vpop.permute.xlu2 %473 }
  0xb6   : > { %v760_v20 = vsel %vm662_vm11, %v695_v63, %v728_v2 }
  0xb7   : > { %v2568_v54 = vpop.permute.xlu1 %498 }
  0xb8   : > { %v2557_v48 = vpop.permute.xlu0 %448 }
  0xbb   : > { %833 = vperm.xlu2 %1874, %v763_v23   ;;  %903 = vperm.xlu0 %1875, %v777_v30  }
  0xbc   : > { %808 = vperm.xlu1 %1873, %v758_v49  }
  0xbd   : > { %v2561_v50 = vpop.permute.xlu2 %488 }
  0xbf   : > { %v2599_v11 = vpop.permute.xlu1 %513 }
  0xc0   : > { %v2578_v59 = vpop.permute.xlu0 %463 }
  0xc3   : > { %898 = vperm.xlu2 %1874, %v776_v25   ;;  %823 = vperm.xlu0 %1875, %v761_v61  }
  0xc4   : > { %938 = vperm.xlu1 %1873, %v784_v62  }
  0xc5   : > { %v2582_v19 = vpop.permute.xlu2 %503 }
  0xc7   : > { %v2620_v1 = vpop.permute.xlu1 %528 }
  0xc8   : > { %v2601_v39 = vpop.permute.xlu0 %478 }
  0xcb   : > { %818 = vperm.xlu2 %1874, %v760_v20   ;;  %888 = vperm.xlu0 %1875, %v774_v24  }
  0xcc   : > { %933 = vperm.xlu1 %1873, %v783_v37  }
  0xcd   : > { %v2603_v9 = vpop.permute.xlu2 %518 }
  0xcf   : > { %v2626_v45 = vpop.permute.xlu1 %543 }
  0xd0   : > { %v494_v23 = vpop.permute.xlu0 %493 }
  0xd1   : > { %v611_v41 = vmul.f32 %v2265_v3, %v494_v23  ;;  %v612_v8 = vmul.f32 %v2267_v4, %v494_v23 }
  0xd3   : > { %883 = vperm.xlu2 %1874, %v773_v18   ;;  %878 = vperm.xlu0 %1875, %v772_v22  }
  0xd4   : > { %858 = vperm.xlu1 %1873, %v768_v44  }
  0xd5   : > { %v2622_v30 = vpop.permute.xlu2 %533 }
  0xd7   : > { %v2633_v46 = vpop.permute.xlu1 %558 }
  0xd8   : > { %v2628_v32 = vpop.permute.xlu0 %508 }
  0xdb   : > { %868 = vperm.xlu2 %1874, %v2475_v55  }
  0xdc   : > { %923 = vperm.xlu1 %1873, %v2498_v5  }
  0xdd   : > { %v2630_v27 = vpop.permute.xlu2 %548 }
  0xdf   : > { %v574_v53 = vpop.permute.xlu1 %573 }
  0xe0   : > { %v2635_v49 = vpop.permute.xlu0 %523  ;;  %v643_v5 = vmul.f32 %v2265_v3, %v574_v53  ;;  %v644_v15 = vmul.f32 %v2267_v4, %v574_v53 }
  0xe4   : > { %843 = vperm.xlu1 %1873, %v2502_v28  }
  0xe5   : > { %v2637_v52 = vpop.permute.xlu2 %563 }
  0xe8   : > { %v2640_v55 = vpop.permute.xlu0 %538 }
  0xec   : > { %908 = vperm.xlu1 %1873, %v2506_v6  }
  0xf0   : > { %v2645_v61 = vpop.permute.xlu0 %553 }
  0xf4   : > { %828 = vperm.xlu1 %1873, %v2524_v10  }
  0xf5   : > { %v944_v36 = vpop.permute.xlu2 %943 }
  0xf6   : > { %v1008_v56 = vsub.f32 %v643_v5, %v944_v36  ;;  %v1009_v28 = vsub.f32 %v644_v15, %v944_v36  ;;  %v585_v5 = vmul.f32 %v2265_v3, %v2389_v42  ;;  %v586_v15 = vmul.f32 %v2267_v4, %v2389_v42 }
  0xf8   : > { %v1134_v58 = vmul.f32 1.442695, %v1008_v56  ;;  %v1136_v25 = vmul.f32 1.442695, %v1009_v28  ;;  %v2659_v2 = vpop.permute.xlu0 %568 }
  0xfa   : > { %1876 = vpow2.f32 %v1134_v58 }
  0xfb   : > { %1878 = vpow2.f32 %v1136_v25 }
  0xfc   : > { %893 = vperm.xlu1 %1873, %v2534_v26   ;;  %v581_v26 = vmul.f32 %v2265_v3, %v2437_v29 }
  0xfd   : > { %v2648_v6 = vpop.permute.xlu2 %928 }
 0x100   : > { %v2650_v62 = vpop.eup %1876 }
 0x101   : > { %v2652_v63 = vpop.eup %1878  ;;  %1178 = vmatpush.xpose.msra.mxu2 %v2650_v62 }
 0x102   : > { %1198 = vmatpush.xpose.msra.mxu3 %v2652_v63 }
 0x104   : > { %813 = vperm.xlu1 %1873, %v2538_v34  }
 0x105   : > { %v2657_v10 = vpop.permute.xlu2 %848 }
 0x10c   : > { %873 = vperm.xlu1 %1873, %v2547_v38  }
 0x10d   : > { %v2668_v13 = vpop.permute.xlu2 %913  ;;  %v864_v20 = vpop.permute.xlu0 %863 }
 0x10e   : > { %v789_v34 = vpop.permute.xlu1 %788  ;;  %v976_v24 = vsub.f32 %v611_v41, %v864_v20  ;;  %v977_v37 = vsub.f32 %v612_v8, %v864_v20  ;;  %v584_v41 = vmul.f32 %v2267_v4, %v2483_v60 }
 0x10f   : > { %v946_v14 = vsub.f32 %v581_v26, %v789_v34  ;;  %v947_v33 = vsub.f32 %v582_v12, %v789_v34  ;;  %v583_v26 = vmul.f32 %v2265_v3, %v2483_v60 }
 0x110   : > { %v1070_v40 = vmul.f32 1.442695, %v976_v24  ;;  %v1072_v38 = vmul.f32 1.442695, %v977_v37  ;;  %v587_v24 = vmul.f32 %v2265_v3, %v2395_v47  ;;  %v588_v37 = vmul.f32 %v2267_v4, %v2395_v47 }
 0x111   : > { %v1010_v21 = vmul.f32 1.442695, %v946_v14  ;;  %v1012_v43 = vmul.f32 1.442695, %v947_v33 }
 0x112   : > { %1880 = vpow2.f32 %v1070_v40 }
 0x113   : > { %1882 = vpow2.f32 %v1072_v38 }
 0x114   : > { %1884 = vpow2.f32 %v1010_v21 }
 0x115   : > { %v2670_v35 = vpop.permute.xlu2 %833  ;;  %v2672_v29 = vpop.permute.xlu0 %853  ;;  %1886 = vpow2.f32 %v1012_v43 }
 0x116   : > { %v794_v18 = vpop.permute.xlu1 %793 }
 0x117   : > { %v948_v8 = vsub.f32 %v583_v26, %v794_v18  ;;  %v949_v42 = vsub.f32 %v584_v41, %v794_v18  ;;  %v593_v18 = vmul.f32 %v2265_v3, %v2557_v48  ;;  %v589_v26 = vmul.f32 %v2265_v3, %v2406_v57 }
 0x118   : > { %v2674_v22 = vpop.eup %1880  ;;  %v590_v41 = vmul.f32 %v2267_v4, %v2406_v57 }
 0x119   : > { %3294 = vst [vmem:[#allocation6_spill] sm:$0xff] %v2674_v22  ;;  %v2676_v44 = vpop.eup %1882  ;;  %1138 = vmatpush.xpose.msra.mxu0 %v2674_v22  ;;  %v1014_v14 = vmul.f32 1.442695, %v948_v8  ;;  %v1016_v38 = vmul.f32 1.442695, %v949_v42 }
 0x11a   : > { %3295 = vst [vmem:[#allocation7_spill] sm:$0xff] %v2676_v44  ;;  %v2679_v23 = vpop.eup %1884  ;;  %1158 = vmatpush.xpose.msra.mxu1 %v2676_v44 }
 0x11b   : > { %3296 = vst [vmem:[#allocation8_spill] sm:$0xff] %v2679_v23  ;;  %v2682_v53 = vpop.eup %1886 }
 0x11c   : > { %3297 = vst [vmem:[#allocation9_spill] sm:$0xff] %v2682_v53  ;;  %v1218_v36 = vadd.f32 %v2682_v53, %v2679_v23 }
 0x11d   : > { %v2690_v56 = vpop.permute.xlu0 %918  ;;  %v2692_v58 = vpop.permute.xlu2 %898 }
 0x11e   : > { %v799_v28 = vpop.permute.xlu1 %798  ;;  %1219 = vadd.xlane.f32.xlu0 %v1218_v36 }
 0x11f   : > { %v950_v25 = vsub.f32 %v585_v5, %v799_v28  ;;  %v951_v12 = vsub.f32 %v586_v15, %v799_v28  ;;  %v594_v15 = vmul.f32 %v2267_v4, %v2557_v48 }
 0x121   : > { %v1018_v20 = vmul.f32 1.442695, %v950_v25  ;;  %v1020_v34 = vmul.f32 1.442695, %v951_v12 }
 0x123   : > { %1888 = vpow2.f32 %v1018_v20 }
 0x124   : > { %1890 = vpow2.f32 %v1020_v34 }
 0x125   : > { %v2702_v33 = vpop.permute.xlu0 %838  ;;  %v819_v60 = vpop.permute.xlu2 %818  ;;  %1892 = vpow2.f32 %v1014_v14 }
 0x126   : > { %v804_v40 = vpop.permute.xlu1 %803  ;;  %1894 = vpow2.f32 %v1016_v38  ;;  %v958_v28 = vsub.f32 %v593_v18, %v819_v60  ;;  %v959_v12 = vsub.f32 %v594_v15, %v819_v60  ;;  %v595_v15 = vmul.f32 %v2265_v3, %v2420_v0 }
 0x127   : > { %v952_v21 = vsub.f32 %v587_v24, %v804_v40  ;;  %v953_v43 = vsub.f32 %v588_v37, %v804_v40  ;;  %v599_v24 = vmul.f32 %v2265_v3, %v2578_v59  ;;  %v600_v37 = vmul.f32 %v2267_v4, %v2578_v59 }
 0x128   : > { %v1034_v14 = vmul.f32 1.442695, %v958_v28  ;;  %v1036_v38 = vmul.f32 1.442695, %v959_v12  ;;  %v596_v59 = vmul.f32 %v2267_v4, %v2420_v0  ;;  %v642_v12 = vmul.f32 %v2267_v4, %v2659_v2 }
 0x129   : > { %v1022_v5 = vmul.f32 1.442695, %v952_v21  ;;  %v1024_v47 = vmul.f32 1.442695, %v953_v43  ;;  %v2708_v36 = vpop.eup %1888  ;;  %v964_v21 = vsub.f32 %v599_v24, %v2670_v35  ;;  %v965_v43 = vsub.f32 %v600_v37, %v2670_v35 }
 0x12a   : > { %v2710_v25 = vpop.eup %1890  ;;  %v641_v35 = vmul.f32 %v2265_v3, %v2659_v2  ;;  %v601_v2 = vmul.f32 %v2265_v3, %v2446_v31 }
 0x12b   : > { %1896 = vpow2.f32 %v1022_v5  ;;  %v1224_v8 = vadd.f32 %v2710_v25, %v2708_v36  ;;  %v2720_v34 = vpop.eup %1892 }
 0x12c   : > { %1898 = vpow2.f32 %v1024_v47  ;;  %v2726_v40 = vpop.eup %1894 }
 0x12d   : > { %v2718_v20 = vpop.permute.xlu0 %903  ;;  %1225 = vadd.xlane.f32.xlu2 %v1224_v8  ;;  %3298 = vst [vmem:[#allocation10_spill] sm:$0xff] %v2726_v40  ;;  %1900 = vpow2.f32 %v1034_v14  ;;  %v1221_v47 = vadd.f32 %v2726_v40, %v2720_v34  ;;  %v1048_v8 = vmul.f32 1.442695, %v965_v43 }
 0x12e   : > { %v809_v48 = vpop.permute.xlu1 %808  ;;  %1902 = vpow2.f32 %v1036_v38 }
 0x12f   : > { %v954_v42 = vsub.f32 %v589_v26, %v809_v48  ;;  %v955_v57 = vsub.f32 %v590_v41, %v809_v48  ;;  %v605_v26 = vmul.f32 %v2265_v3, %v2601_v39  ;;  %v1046_v41 = vmul.f32 1.442695, %v964_v21 }
 0x131   : > { %v1026_v60 = vmul.f32 1.442695, %v954_v42  ;;  %v1028_v18 = vmul.f32 1.442695, %v955_v57  ;;  %v2730_v5 = vpop.eup %1896  ;;  %v606_v57 = vmul.f32 %v2267_v4, %v2601_v39  ;;  %v970_v38 = vsub.f32 %v605_v26, %v2657_v10 }
 0x132   : > { %v2738_v28 = vpop.eup %1898  ;;  %v966_v39 = vsub.f32 %v601_v2, %v2702_v33  ;;  %v638_v2 = vmul.f32 %v2267_v4, %v2633_v46 }
 0x133   : > { %1904 = vpow2.f32 %v1026_v60  ;;  %v1227_v0 = vadd.f32 %v2738_v28, %v2730_v5  ;;  %v2753_v60 = vpop.eup %1900 }
 0x134   : > { %1906 = vpow2.f32 %v1028_v18  ;;  %v602_v18 = vmul.f32 %v2267_v4, %v2446_v31  ;;  %v639_v31 = vmul.f32 %v2265_v3, %v2637_v52 }
 0x135   : > { %v824_v48 = vpop.permute.xlu0 %823  ;;  %1228 = vadd.xlane.f32.xlu0 %v1227_v0  ;;  %1908 = vpow2.f32 %v1046_v41  ;;  %v1058_v41 = vmul.f32 1.442695, %v970_v38 }
 0x136   : > { %1222 = vadd.xlane.f32.xlu1 %v1221_v47  ;;  %v939_v42 = vpop.permute.xlu1 %938  ;;  %v960_v24 = vsub.f32 %v595_v15, %v824_v48  ;;  %v961_v37 = vsub.f32 %v596_v59, %v824_v48  ;;  %v971_v15 = vsub.f32 %v606_v57, %v2657_v10  ;;  %v2758_v47 = vpop.eup %1902  ;;  %1910 = vpow2.f32 %v1048_v8 }
 0x137   : > { %v1006_v14 = vsub.f32 %v641_v35, %v939_v42  ;;  %v1007_v53 = vsub.f32 %v642_v12, %v939_v42  ;;  %v2761_v35 = vpop.permute.xlu2 %883  ;;  %v967_v0 = vsub.f32 %v602_v18, %v2702_v33  ;;  %v640_v10 = vmul.f32 %v2267_v4, %v2637_v52 }
 0x138   : > { %v1038_v21 = vmul.f32 1.442695, %v960_v24  ;;  %v1040_v43 = vmul.f32 1.442695, %v961_v37  ;;  %v1060_v8 = vmul.f32 1.442695, %v971_v15  ;;  %v637_v37 = vmul.f32 %v2265_v3, %v2633_v46 }
 0x139   : > { %v1130_v59 = vmul.f32 1.442695, %v1006_v14  ;;  %v1132_v12 = vmul.f32 1.442695, %v1007_v53  ;;  %v2763_v26 = vpop.eup %1904  ;;  %v1236_v53 = vadd.f32 %v2758_v47, %v2753_v60  ;;  %v1050_v14 = vmul.f32 1.442695, %v966_v39 }
 0x13a   : > { %1912 = vpow2.f32 %v1038_v21  ;;  %v2766_v48 = vpop.eup %1906  ;;  %v1052_v38 = vmul.f32 1.442695, %v967_v0  ;;  %v607_v18 = vmul.f32 %v2265_v3, %v2528_v16  ;;  %v1002_v15 = vsub.f32 %v637_v37, %v2648_v6 }
 0x13b   : > { %1914 = vpow2.f32 %v1040_v43  ;;  %v1230_v33 = vadd.f32 %v2766_v48, %v2763_v26  ;;  %v2780_v52 = vpop.eup %1908  ;;  %v1003_v46 = vsub.f32 %v638_v2, %v2648_v6  ;;  %v610_v6 = vmul.f32 %v2267_v4, %v2561_v50 }
 0x13c   : > { %1916 = vpow2.f32 %v1130_v59  ;;  %v2784_v43 = vpop.eup %1910 }
 0x13d   : > { %v2774_v42 = vpop.permute.xlu0 %888  ;;  %1918 = vpow2.f32 %v1132_v12  ;;  %1237 = vadd.xlane.f32.xlu0 %v1236_v53  ;;  %v608_v12 = vmul.f32 %v2267_v4, %v2528_v16  ;;  %v609_v16 = vmul.f32 %v2265_v3, %v2561_v50  ;;  %v614_v50 = vmul.f32 %v2267_v4, %v2568_v54 }
 0x13e   : > { %v934_v24 = vpop.permute.xlu1 %933  ;;  %1231 = vadd.xlane.f32.xlu1 %v1230_v33  ;;  %1920 = vpow2.f32 %v1058_v41  ;;  %v613_v41 = vmul.f32 %v2265_v3, %v2568_v54 }
 0x13f   : > { %v1004_v57 = vsub.f32 %v639_v31, %v934_v24  ;;  %v1005_v21 = vsub.f32 %v640_v10, %v934_v24  ;;  %1922 = vpow2.f32 %v1060_v8  ;;  %v972_v10 = vsub.f32 %v607_v18, %v2672_v29  ;;  %v869_v37 = vpop.permute.xlu2 %868 }
 0x140   : > { %v2789_v39 = vpop.eup %1912  ;;  %1924 = vpow2.f32 %v1050_v14  ;;  %v973_v33 = vsub.f32 %v608_v12, %v2672_v29  ;;  %v1122_v8 = vmul.f32 1.442695, %v1002_v15  ;;  %v1124_v14 = vmul.f32 1.442695, %v1003_v46 }
 0x141   : > { %v1126_v59 = vmul.f32 1.442695, %v1004_v57  ;;  %v1128_v0 = vmul.f32 1.442695, %v1005_v21  ;;  %v2794_v31 = vpop.eup %1914  ;;  %1926 = vpow2.f32 %v1052_v38  ;;  %v1245_v29 = vadd.f32 %v2784_v43, %v2780_v52 }
 0x142   : > { %v2797_v53 = vpop.eup %1916  ;;  %v1239_v57 = vadd.f32 %v2794_v31, %v2789_v39  ;;  %v1062_v21 = vmul.f32 1.442695, %v972_v10  ;;  %v617_v46 = vmul.f32 %v2265_v3, %v2628_v32  ;;  %v978_v23 = vsub.f32 %v613_v41, %v869_v37 }
 0x143   : > { %3299 = vst [vmem:[#allocation11_spill] sm:$0xff] %v2797_v53  ;;  %v2802_v24 = vpop.eup %1918  ;;  %1928 = vpow2.f32 %v1126_v59  ;;  %1179 = vmatpush.xpose.msra.mxu2 %v2797_v53  ;;  %v631_v53 = vmul.f32 %v2265_v3, %v2626_v45  ;;  %v979_v54 = vsub.f32 %v614_v50, %v869_v37  ;;  %v618_v41 = vmul.f32 %v2267_v4, %v2628_v32 }
 0x144   : > { %3300 = vst [vmem:[#allocation12_spill] sm:$0xff] %v2802_v24  ;;  %1930 = vpow2.f32 %v1128_v0  ;;  %1199 = vmatpush.xpose.msra.mxu3 %v2802_v24  ;;  %v2814_v38 = vpop.eup %1920  ;;  %v1064_v0 = vmul.f32 1.442695, %v973_v33 }
 0x145   : > { %v879_v18 = vpop.permute.xlu0 %878  ;;  %v2818_v12 = vpop.eup %1922  ;;  %1246 = vadd.xlane.f32.xlu0 %v1245_v29  ;;  %1932 = vpow2.f32 %v1122_v8  ;;  %v633_v29 = vmul.f32 %v2265_v3, %v2630_v27  ;;  %v634_v8 = vmul.f32 %v2267_v4, %v2630_v27  ;;  %v996_v32 = vsub.f32 %v631_v53, %v2668_v13 }
 0x146   : > { %v859_v2 = vpop.permute.xlu1 %858  ;;  %1240 = vadd.xlane.f32.xlu1 %v1239_v57  ;;  %v2822_v24 = vpop.eup %1924  ;;  %1934 = vpow2.f32 %v1124_v14  ;;  %v636_v14 = vmul.f32 %v2267_v4, %v2645_v61  ;;  %v1074_v57 = vmul.f32 1.442695, %v978_v23  ;;  %v1076_v50 = vmul.f32 1.442695, %v979_v54 }
 0x147   : > { %v974_v15 = vsub.f32 %v609_v16, %v859_v2  ;;  %v975_v59 = vsub.f32 %v610_v6, %v859_v2  ;;  %v2826_v40 = vpop.eup %1926  ;;  %v632_v16 = vmul.f32 %v2267_v4, %v2626_v45  ;;  %v982_v6 = vsub.f32 %v617_v46, %v879_v18 }
 0x148   : > { %3301 = vst [vmem:[#allocation13_spill] sm:$0xff] %v2826_v40  ;;  %1936 = vpow2.f32 %v1062_v21  ;;  %v635_v45 = vmul.f32 %v2265_v3, %v2645_v61  ;;  %v1254_v21 = vadd.f32 %v2818_v12, %v2814_v38  ;;  %v998_v23 = vsub.f32 %v633_v29, %v2690_v56 }
 0x149   : > { %v1066_v10 = vmul.f32 1.442695, %v974_v15  ;;  %v1068_v2 = vmul.f32 1.442695, %v975_v59  ;;  %v2830_v33 = vpop.eup %1928  ;;  %1938 = vpow2.f32 %v1064_v0  ;;  %v983_v15 = vsub.f32 %v618_v41, %v879_v18 }
 0x14a   : > { %v2838_v37 = vpop.eup %1930  ;;  %1180 = vmatpush.xpose.msra.mxu2 %v2830_v33  ;;  %v1082_v27 = vmul.f32 1.442695, %v982_v6  ;;  %v1248_v59 = vadd.f32 %v2826_v40, %v2822_v24  ;;  %v619_v18 = vmul.f32 %v2265_v3, %v2599_v11  ;;  %v999_v6 = vsub.f32 %v634_v8, %v2690_v56 }
 0x14b   : > { %1940 = vpow2.f32 %v1066_v10  ;;  %1200 = vmatpush.xpose.msra.mxu3 %v2838_v37  ;;  %v2851_v46 = vpop.eup %1932  ;;  %v997_v10 = vsub.f32 %v632_v16, %v2668_v13  ;;  %v1084_v41 = vmul.f32 1.442695, %v983_v15  ;;  %v620_v16 = vmul.f32 %v2267_v4, %v2599_v11 }
 0x14c   : > { %1942 = vpow2.f32 %v1068_v2  ;;  %v2854_v54 = vpop.eup %1934  ;;  %v984_v13 = vsub.f32 %v619_v18, %v2761_v35  ;;  %v1114_v8 = vmul.f32 1.442695, %v998_v23  ;;  %v1116_v15 = vmul.f32 1.442695, %v999_v6 }
 0x14d   : > { %1944 = vpow2.f32 %v1074_v57  ;;  %1255 = vadd.xlane.f32.xlu0 %v1254_v21  ;;  %v985_v21 = vsub.f32 %v620_v16, %v2761_v35  ;;  %v1263_v23 = vadd.f32 %v2676_v44, %v2674_v22  ;;  %v625_v6 = vmul.f32 %v2265_v3, %v2620_v1 }
 0x14e   : > { %v924_v61 = vpop.permute.xlu1 %923  ;;  %1249 = vadd.xlane.f32.xlu1 %v1248_v59  ;;  %v2860_v2 = vpop.eup %1936  ;;  %1946 = vpow2.f32 %v1076_v50  ;;  %1181 = vmatpush.xpose.msra.mxu2 %v2851_v46  ;;  %v603_v50 = vmul.f32 %v2265_v3, %v2530_v17  ;;  %v1086_v59 = vmul.f32 1.442695, %v984_v13 }
 0x14f   : > { %v1000_v0 = vsub.f32 %v635_v45, %v924_v61  ;;  %v1001_v53 = vsub.f32 %v636_v14, %v924_v61  ;;  %3302 = vst [vmem:[#allocation14_spill] sm:$0xff] %v2860_v2  ;;  %1201 = vmatpush.xpose.msra.mxu3 %v2854_v54  ;;  %v2864_v14 = vpop.eup %1938  ;;  %v1110_v61 = vmul.f32 1.442695, %v996_v32  ;;  %1948 = vpow2.f32 %v1082_v27 }
 0x150   : > { %3303 = vst [vmem:[#allocation15_spill] sm:$0xff] %v2864_v14  ;;  %v604_v32 = vmul.f32 %v2267_v4, %v2530_v17  ;;  %v1112_v27 = vmul.f32 1.442695, %v997_v10  ;;  %v990_v16 = vsub.f32 %v625_v6, %v2692_v58 }
 0x151   : > { %v1118_v29 = vmul.f32 1.442695, %v1000_v0  ;;  %v1120_v45 = vmul.f32 1.442695, %v1001_v53  ;;  %v2867_v56 = vpop.eup %1940  ;;  %v1257_v0 = vadd.f32 %v2864_v14, %v2860_v2 }
 0x152   : > { %3304 = vst [vmem:[#allocation16_spill] sm:$0xff] %v2867_v56  ;;  %v2871_v57 = vpop.eup %1942  ;;  %1139 = vmatpush.xpose.msra.mxu0 %v2867_v56 }
 0x153   : > { %1950 = vpow2.f32 %v1118_v29  ;;  %3305 = vst [vmem:[#allocation17_spill] sm:$0xff] %v2871_v57  ;;  %1159 = vmatpush.xpose.msra.mxu1 %v2871_v57  ;;  %v2880_v11 = vpop.eup %1944  ;;  %v1088_v29 = vmul.f32 1.442695, %v985_v21  ;;  %v629_v21 = vmul.f32 %v2265_v3, %v2640_v55 }
 0x154   : > { %1952 = vpow2.f32 %v1120_v45  ;;  %v2886_v18 = vpop.eup %1946 }
 0x155   : > { %1954 = vpow2.f32 %v1084_v41  ;;  %v2888_v35 = vpop.eup %1948  ;;  %1264 = vadd.xlane.f32.xlu0 %v1263_v23 }
 0x156   : > { %1956 = vpow2.f32 %v1110_v61  ;;  %v844_v53 = vpop.permute.xlu1 %843  ;;  %1258 = vadd.xlane.f32.xlu1 %v1257_v0  ;;  %1140 = vmatpush.xpose.msra.mxu0 %v2860_v2  ;;  %v628_v0 = vmul.f32 %v2267_v4, %v2622_v30 }
 0x157   : > { %1958 = vpow2.f32 %v1114_v8  ;;  %v968_v17 = vsub.f32 %v603_v50, %v844_v53  ;;  %v969_v10 = vsub.f32 %v604_v32, %v844_v53  ;;  %1160 = vmatpush.xpose.msra.mxu1 %v2864_v14  ;;  %v626_v50 = vmul.f32 %v2267_v4, %v2620_v1 }
 0x158   : > { %1960 = vpow2.f32 %v1116_v15  ;;  %v627_v32 = vmul.f32 %v2265_v3, %v2622_v30  ;;  %v1098_v53 = vmul.f32 1.442695, %v990_v16  ;;  %v993_v30 = vsub.f32 %v628_v0, %v2718_v20 }
 0x159   : > { %v2892_v41 = vpop.eup %1950  ;;  %1962 = vpow2.f32 %v1112_v27  ;;  %v1054_v45 = vmul.f32 1.442695, %v968_v17  ;;  %v1056_v61 = vmul.f32 1.442695, %v969_v10  ;;  %v991_v23 = vsub.f32 %v626_v50, %v2692_v58 }
 0x15a   : > { %v2896_v13 = vpop.eup %1952  ;;  %1964 = vpow2.f32 %v1086_v59  ;;  %1182 = vmatpush.xpose.msra.mxu2 %v2892_v41  ;;  %v630_v59 = vmul.f32 %v2267_v4, %v2640_v55  ;;  %1141 = vmatpush.xpose.msra.mxu0 %v2814_v38  ;;  %v1266_v10 = vadd.f32 %v2886_v18, %v2880_v11  ;;  %v992_v6 = vsub.f32 %v627_v32, %v2718_v20 }
 0x15b   : > { %3306 = vst [vmem:[#allocation18_spill] sm:$0xff] %v2896_v13  ;;  %v2900_v8 = vpop.eup %1954  ;;  %1966 = vpow2.f32 %v1054_v45  ;;  %1202 = vmatpush.xpose.msra.mxu3 %v2896_v13  ;;  %1161 = vmatpush.xpose.msra.mxu1 %v2818_v12  ;;  %v1100_v50 = vmul.f32 1.442695, %v991_v23  ;;  %v1104_v20 = vmul.f32 1.442695, %v993_v30  ;;  %v598_v23 = vmul.f32 %v2267_v4, %v2462_v51 }
 0x15c   : > { %v2905_v15 = vpop.eup %1956  ;;  %1968 = vpow2.f32 %v1056_v61  ;;  %v1272_v17 = vadd.f32 %v2900_v8, %v2888_v35  ;;  %v621_v30 = vmul.f32 %v2265_v3, %v2603_v9 }
 0x15d   : > { %v2909_v27 = vpop.eup %1958  ;;  %1970 = vpow2.f32 %v1088_v29 }
 0x15e   : > { %v2918_v1 = vpop.eup %1960  ;;  %1183 = vmatpush.xpose.msra.mxu2 %v2909_v27  ;;  %v909_v55 = vpop.permute.xlu1 %908  ;;  %1273 = vadd.xlane.f32.xlu0 %v1272_v17  ;;  %1972 = vpow2.f32 %v1098_v53 }
 0x15f   : > { %v2927_v58 = vpop.eup %1962  ;;  %1203 = vmatpush.xpose.msra.mxu3 %v2918_v1  ;;  %v994_v29 = vsub.f32 %v629_v21, %v909_v55  ;;  %v995_v45 = vsub.f32 %v630_v59, %v909_v55  ;;  %1267 = vadd.xlane.f32.xlu1 %v1266_v10  ;;  %v1102_v21 = vmul.f32 1.442695, %v992_v6  ;;  %v597_v59 = vmul.f32 %v2265_v3, %v2462_v51 }
 0x160   : > { %v2931_v61 = vpop.eup %1964 }
 0x161   : > { %v2934_v16 = vpop.eup %1966  ;;  %v1106_v14 = vmul.f32 1.442695, %v994_v29  ;;  %v1108_v2 = vmul.f32 1.442695, %v995_v45 }
 0x162   : > { %v2936_v44 = vpop.eup %1968  ;;  %1142 = vmatpush.xpose.msra.mxu0 %v2934_v16  ;;  %1184 = vmatpush.xpose.msra.mxu2 %v2905_v15 }
 0x163   : > { %3307 = vst [vmem:[#allocation19_spill] sm:$0xff] %v2936_v44  ;;  %v2940_v32 = vpop.eup %1970  ;;  %1974 = vpow2.f32 %v1106_v14  ;;  %1162 = vmatpush.xpose.msra.mxu1 %v2936_v44  ;;  %1204 = vmatpush.xpose.msra.mxu3 %v2927_v58 }
 0x164   : > { %1976 = vpow2.f32 %v1108_v2  ;;  %v1275_v0 = vadd.f32 %v2940_v32, %v2931_v61  ;;  %v2952_v10 = vpop.eup %1972 }
 0x165   : > { %1978 = vpow2.f32 %v1100_v50  ;;  %v623_v50 = vmul.f32 %v2265_v3, %v2635_v49 }
 0x166   : > { %1143 = vmatpush.xpose.msra.mxu0 %v2822_v24  ;;  %v829_v53 = vpop.permute.xlu1 %828  ;;  %1980 = vpow2.f32 %v1102_v21  ;;  %v624_v21 = vmul.f32 %v2267_v4, %v2635_v49 }
 0x167   : > { %1163 = vmatpush.xpose.msra.mxu1 %v2826_v40  ;;  %v962_v14 = vsub.f32 %v597_v59, %v829_v53  ;;  %v963_v17 = vsub.f32 %v598_v23, %v829_v53  ;;  %1982 = vpow2.f32 %v1104_v20  ;;  %1276 = vadd.xlane.f32.xlu1 %v1275_v0  ;;  %v622_v59 = vmul.f32 %v2267_v4, %v2603_v9 }
 0x168   : > { %v986_v53 = vsub.f32 %v621_v30, %v2774_v42 }
 0x169   : > { %v2954_v2 = vpop.eup %1974  ;;  %v1042_v55 = vmul.f32 1.442695, %v962_v14  ;;  %v1044_v51 = vmul.f32 1.442695, %v963_v17 }
 0x16a   : > { %v2956_v6 = vpop.eup %1976  ;;  %1144 = vmatpush.xpose.msra.mxu0 %v2780_v52  ;;  %1185 = vmatpush.xpose.msra.mxu2 %v2954_v2  ;;  %v1090_v40 = vmul.f32 1.442695, %v986_v53 }
 0x16b   : > { %v2960_v29 = vpop.eup %1978  ;;  %1984 = vpow2.f32 %v1042_v55  ;;  %1164 = vmatpush.xpose.msra.mxu1 %v2784_v43  ;;  %1205 = vmatpush.xpose.msra.mxu3 %v2956_v6  ;;  %v987_v55 = vsub.f32 %v622_v59, %v2774_v42  ;;  %v591_v42 = vmul.f32 %v2265_v3, %v2422_v7 }
 0x16c   : > { %1986 = vpow2.f32 %v1044_v51  ;;  %v2964_v45 = vpop.eup %1980  ;;  %v1284_v23 = vadd.f32 %v2960_v29, %v2952_v10 }
 0x16d   : > { %v2972_v20 = vpop.eup %1982  ;;  %v1092_v30 = vmul.f32 1.442695, %v987_v55  ;;  %v615_v55 = vmul.f32 %v2265_v3, %v2582_v19 }
 0x16e   : > { %1186 = vmatpush.xpose.msra.mxu2 %v2964_v45  ;;  %v894_v0 = vpop.permute.xlu1 %893 }
 0x16f   : > { %1206 = vmatpush.xpose.msra.mxu3 %v2972_v20  ;;  %v988_v14 = vsub.f32 %v623_v50, %v894_v0  ;;  %v989_v17 = vsub.f32 %v624_v21, %v894_v0  ;;  %1285 = vadd.xlane.f32.xlu1 %v1284_v23  ;;  %v592_v50 = vmul.f32 %v2267_v4, %v2422_v7 }
 0x170   : > { %v1293_v21 = vadd.f32 %v2927_v58, %v2905_v15 }
 0x171   : > { %v2982_v49 = vpop.eup %1984  ;;  %v1094_v51 = vmul.f32 1.442695, %v988_v14  ;;  %v1096_v22 = vmul.f32 1.442695, %v989_v17 }
 0x172   : > { %3308 = vst [vmem:[#allocation20_spill] sm:$0xff] %v2982_v49  ;;  %v2984_v9 = vpop.eup %1986  ;;  %1145 = vmatpush.xpose.msra.mxu0 %v2982_v49  ;;  %1187 = vmatpush.xpose.msra.mxu2 %v2952_v10 }
 0x173   : > { %3309 = vst [vmem:[#allocation21_spill] sm:$0xff] %v2984_v9  ;;  %1988 = vpow2.f32 %v1094_v51  ;;  %1165 = vmatpush.xpose.msra.mxu1 %v2984_v9  ;;  %1207 = vmatpush.xpose.msra.mxu3 %v2960_v29  ;;  %v616_v51 = vmul.f32 %v2267_v4, %v2582_v19  ;;  %v1290_v4 = vadd.f32 %v2956_v6, %v2954_v2 }
 0x174   : > { %1990 = vpow2.f32 %v1096_v22 }
 0x175   : > { %1992 = vpow2.f32 %v1090_v40 }
 0x176   : > { %1146 = vmatpush.xpose.msra.mxu0 %v2789_v39  ;;  %v814_v59 = vpop.permute.xlu1 %813  ;;  %1994 = vpow2.f32 %v1092_v30 }
 0x177   : > { %1166 = vmatpush.xpose.msra.mxu1 %v2794_v31  ;;  %v956_v23 = vsub.f32 %v591_v42, %v814_v59  ;;  %v957_v0 = vsub.f32 %v592_v50, %v814_v59  ;;  %1294 = vadd.xlane.f32.xlu1 %v1293_v21  ;;  %v1302_v42 = vadd.f32 %v2854_v54, %v2851_v46 }
 0x179   : > { %v2998_v22 = vpop.eup %1988  ;;  %v1030_v53 = vmul.f32 1.442695, %v956_v23  ;;  %v1032_v14 = vmul.f32 1.442695, %v957_v0 }
 0x17a   : > { %v3000_v17 = vpop.eup %1990  ;;  %1147 = vmatpush.xpose.msra.mxu0 %v2753_v60  ;;  %1188 = vmatpush.xpose.msra.mxu2 %v2998_v22 }
 0x17b   : > { %1996 = vpow2.f32 %v1030_v53  ;;  %1167 = vmatpush.xpose.msra.mxu1 %v2758_v47  ;;  %1208 = vmatpush.xpose.msra.mxu3 %v3000_v17  ;;  %v1281_v7 = vadd.f32 %v3000_v17, %v2998_v22  ;;  %v3008_v40 = vpop.eup %1992 }
 0x17c   : > { %1998 = vpow2.f32 %v1032_v14  ;;  %v3014_v30 = vpop.eup %1994  ;;  %v1311_v14 = vadd.f32 %v2652_v63, %v2650_v62 }
 0x17d   : > { %1282 = vadd.xlane.f32.xlu0 %v1281_v7  ;;  %3310 = vst [vmem:[#allocation22_spill] sm:$0xff] %v3014_v30 }
 0x17e   : > { %1189 = vmatpush.xpose.msra.mxu2 %v3008_v40  ;;  %v874_v50 = vpop.permute.xlu1 %873 }
 0x17f   : > { %1209 = vmatpush.xpose.msra.mxu3 %v3014_v30  ;;  %v980_v21 = vsub.f32 %v615_v55, %v874_v50  ;;  %v981_v59 = vsub.f32 %v616_v51, %v874_v50  ;;  %1303 = vadd.xlane.f32.xlu1 %v1302_v42  ;;  %v1299_v51 = vadd.f32 %v2896_v13, %v2892_v41  ;;  %v413_v50 = vld [vmem:[%s357_s29] sm:$0x1f] }
 0x180   : > { %v1242_v42 = vadd.f32 %v2984_v9, %v2982_v49  ;;  %v1260_v13 = vadd.f32 %v2871_v57, %v2867_v56 }
 0x181   : > { %v3020_v23 = vpop.eup %1996  ;;  %v1078_v3 = vmul.f32 1.442695, %v980_v21  ;;  %v1080_v0 = vmul.f32 1.442695, %v981_v59  ;;  %v414_v21 = vld [vmem:[%s357_s29 + $0x8] sm:$0x1f]  ;;  %s1628_s29 = scalar_lea.hbm %s3267_s6, %s1814_s12 }
 0x182   : > { %v3022_v53 = vpop.eup %1998  ;;  %1148 = vmatpush.xpose.msra.mxu0 %v3020_v23  ;;  %1190 = vmatpush.xpose.msra.mxu2 %v2931_v61  ;;  %s1631_s14 = sshll.u32 %s1628_s29, 4  ;;  %s1632_s14 = int_to_ptr.hbm [resolvable:$true] %s1631_s14 }
 0x183   : > { %2000 = vpow2.f32 %v1078_v3  ;;  %1168 = vmatpush.xpose.msra.mxu1 %v3022_v53  ;;  %1210 = vmatpush.xpose.msra.mxu3 %v2940_v32  ;;  %v1233_v19 = vadd.f32 %v3022_v53, %v3020_v23  ;;  %v3313_v3 = vld [vmem:[#allocation10_spill] sm:$0xff]  ;;  %s2086_s15 = sshra.s32 %s1632_s14, 4  ;;  %s2087_s15 = int_to_ptr.hbm [resolvable:$true] %s2086_s15 }
 0x184   : > { %2002 = vpow2.f32 %v1080_v0  ;;  %v3314_v0 = vld [vmem:[#allocation11_spill] sm:$0xff]  ;;  %s2088_s16 = scalar_lea.hbm %s2087_s15, 512  ;;  %p2093_p1 = scmp.lt.s32.totalorder %s2087_s15, %s3267_s6 }
 0x185   : > { %1291 = vadd.xlane.f32.xlu0 %v1290_v4  ;;  %1234 = vadd.xlane.f32.xlu2 %v1233_v19  ;;  %v3315_v4 = vld [vmem:[#allocation12_spill] sm:$0xff]  ;;  %p2089_p12 = scmp.ne.s32.totalorder %s2087_s15, %s2088_s16  ;;  %p2094_p2 = scmp.lt.s32.totalorder %s2092_s19, %s2088_s16 }
 0x186   : > { %1149 = vmatpush.xpose.msra.mxu0 %v2763_v26  ;;  %1191 = vmatpush.xpose.msra.mxu2 %v2888_v35  ;;  %v1308_v19 = vadd.f32 %v3315_v4, %v3314_v0 }
 0x187   : > { %1169 = vmatpush.xpose.msra.mxu1 %v2766_v48  ;;  %1211 = vmatpush.xpose.msra.mxu3 %v2900_v8  ;;  %p2090_p13 = pnand %p2089_p12, %p2233_p4  ;;  %p2095_p3 = por %p2094_p2, %p2093_p1 }
 0x188   : > { %1312 = vadd.xlane.f32.xlu1 %v1311_v14  ;;  %v1251_v14 = vadd.f32 %v2936_v44, %v2934_v16 }
 0x189   : > { %v3039_v7 = vpop.eup %2000  ;;  %p2091_p0 = pneg %p2090_p13 }
 0x18a   : > { %3311 = vst [vmem:[#allocation23_spill] sm:$0xff] %v3039_v7  ;;  %v3041_v55 = vpop.eup %2002  ;;  %1150 = vmatpush.xpose.msra.mxu0 %v2730_v5  ;;  %1192 = vmatpush.xpose.msra.mxu2 %v3039_v7 }
 0x18b   : > { %3312 = vst [vmem:[#allocation24_spill] sm:$0xff] %v3041_v55  ;;  %1170 = vmatpush.xpose.msra.mxu1 %v2738_v28  ;;  %1212 = vmatpush.xpose.msra.mxu3 %v3041_v55  ;;  %p2096_p5 = pnand %p2095_p3, %p2091_p0 }
 0x18d   : > { %1300 = vadd.xlane.f32.xlu0 %v1299_v51  ;;  %1243 = vadd.xlane.f32.xlu2 %v1242_v42  ;;  %v3316_v51 = vld [vmem:[#allocation8_spill] sm:$0xff]  ;;  %v3317_v42 = vld [vmem:[#allocation9_spill] sm:$0xff] }
 0x18e   : > { %1151 = vmatpush.xpose.msra.mxu0 %v2708_v36  ;;  %1193 = vmatpush.xpose.msra.mxu2 %v2880_v11 }
 0x18f   : > { %1171 = vmatpush.xpose.msra.mxu1 %v2710_v25  ;;  %1213 = vmatpush.xpose.msra.mxu3 %v2886_v18 }
 0x191   : > { %1194 = vmatmul.f32.vlgmr.msra.gmra.mxu2 %v413_v50  ;;  %v1220_v59 = vpop.xlane.xlu0 %1219 }
 0x192   : > { %1152 = vmatpush.xpose.msra.mxu0 %v2720_v34  ;;  %1214 = vmatmul.f32.vlgmr.msra.gmra.mxu3 %v414_v21  ;;  %2004 = vrcp.f32 %v1220_v59 }
 0x193   : > { %1172 = vmatpush.xpose.msra.mxu1 %v3313_v3 }
 0x195   : > { %1309 = vadd.xlane.f32.xlu0 %v1308_v19  ;;  %1252 = vadd.xlane.f32.xlu2 %v1251_v14 }
 0x196   : > { %1153 = vmatpush.xpose.msra.mxu0 %v3316_v51 }
 0x197   : > { %1173 = vmatpush.xpose.msra.mxu1 %v3317_v42 }
 0x198   : > { %v2005_v9 = vpop.eup %2004 }
 0x199   : > { %1154 = vmatmul.f32.vlgmr.msra.gmra.mxu0 %v413_v50  ;;  %v1346_v49 = vmul.f32 %v2005_v9, %v1220_v59 }
 0x19a   : > { %1174 = vmatmul.f32.vlgmr.msra.gmra.mxu1 %v414_v21  ;;  %v1269_v21 = vadd.f32 %v3041_v55, %v3039_v7 }
 0x19b   : > { %v1378_v4 = vsub.f32 2.0, %v1346_v49 }
 0x19d   : > { %1261 = vadd.xlane.f32.xlu2 %v1260_v13  ;;  %v1410_v44 = vmul.f32 %v2005_v9, %v1378_v4 }
 0x19f   : > { %v1442_v19 = vmul.f32 %v3316_v51, %v1410_v44  ;;  %v1443_v14 = vmul.f32 %v3317_v42, %v1410_v44  ;;  %v1278_v44 = vadd.f32 %v3014_v30, %v3008_v40  ;;  %v1287_v30 = vadd.f32 %v2972_v20, %v2964_v45 }
 0x1a0   : > { %v1226_v50 = vpop.xlane.xlu2 %1225 }
 0x1a1   : > { %1506 = vst [vmem:[%s3073_s13] sm:$0xff] %v1442_v19  ;;  %2006 = vrcp.f32 %v1226_v50 }
 0x1a2   : > { %1507 = vst [vmem:[%s3073_s13 + $0x8] sm:$0xff] %v1443_v14 }
 0x1a5   : > { %1270 = vadd.xlane.f32.xlu2 %v1269_v21 }
 0x1a7   : > { %v2007_v13 = vpop.eup %2006 }
 0x1a8   : > { %v1348_v9 = vmul.f32 %v2007_v13, %v1226_v50  ;;  %v1229_v59 = vpop.xlane.xlu0 %1228 }
 0x1a9   : > { %v1223_v49 = vpop.xlane.xlu1 %1222 }
 0x1aa   : > { %2008 = vrcp.f32 %v1223_v49  ;;  %v1380_v4 = vsub.f32 2.0, %v1348_v9 }
 0x1ab   : > { %2010 = vrcp.f32 %v1229_v59 }
 0x1ac   : > { %v1412_v51 = vmul.f32 %v2007_v13, %v1380_v4 }
 0x1ad   : > { %1279 = vadd.xlane.f32.xlu2 %v1278_v44 }
 0x1ae   : > { %v1446_v19 = vmul.f32 %v2708_v36, %v1412_v51  ;;  %v1447_v14 = vmul.f32 %v2710_v25, %v1412_v51 }
 0x1b0   : > { %v2009_v42 = vpop.eup %2008  ;;  %1510 = vst [vmem:[%s3073_s13 + $0x20] sm:$0xff] %v1446_v19  ;;  %v1238_v57 = vpop.xlane.xlu0 %1237 }
 0x1b1   : > { %v1347_v21 = vmul.f32 %v2009_v42, %v1223_v49  ;;  %v2011_v55 = vpop.eup %2010  ;;  %v1232_v56 = vpop.xlane.xlu1 %1231  ;;  %1511 = vst [vmem:[%s3073_s13 + $0x28] sm:$0xff] %v1447_v14  ;;  %2012 = vrcp.f32 %v1238_v57 }
 0x1b2   : > { %v1349_v7 = vmul.f32 %v2011_v55, %v1229_v59  ;;  %2014 = vrcp.f32 %v1232_v56 }
 0x1b3   : > { %v1379_v50 = vsub.f32 2.0, %v1347_v21 }
 0x1b4   : > { %v1381_v13 = vsub.f32 2.0, %v1349_v7 }
 0x1b5   : > { %v1411_v9 = vmul.f32 %v2009_v42, %v1379_v50  ;;  %1288 = vadd.xlane.f32.xlu2 %v1287_v30  ;;  %v1296_v30 = vadd.f32 %v2918_v1, %v2909_v27 }
 0x1b6   : > { %v1413_v36 = vmul.f32 %v2011_v55, %v1381_v13 }
 0x1b7   : > { %v1444_v25 = vmul.f32 %v2720_v34, %v1411_v9  ;;  %v1445_v49 = vmul.f32 %v3313_v3, %v1411_v9  ;;  %v2013_v4 = vpop.eup %2012 }
 0x1b8   : > { %v1448_v59 = vmul.f32 %v2730_v5, %v1413_v36  ;;  %v1449_v44 = vmul.f32 %v2738_v28, %v1413_v36  ;;  %v2015_v51 = vpop.eup %2014  ;;  %v1352_v19 = vmul.f32 %v2013_v4, %v1238_v57  ;;  %v1247_v7 = vpop.xlane.xlu0 %1246 }
 0x1b9   : > { %1508 = vst [vmem:[%s3073_s13 + $0x10] sm:$0xff] %v1444_v25  ;;  %v1241_v42 = vpop.xlane.xlu1 %1240  ;;  %v1350_v34 = vmul.f32 %v2015_v51, %v1232_v56  ;;  %2016 = vrcp.f32 %v1247_v7 }
 0x1ba   : > { %1509 = vst [vmem:[%s3073_s13 + $0x18] sm:$0xff] %v1445_v49  ;;  %v1384_v55 = vsub.f32 2.0, %v1352_v19  ;;  %2018 = vrcp.f32 %v1241_v42  ;;  %v1305_v49 = vadd.f32 %v2838_v37, %v2830_v33 }
 0x1bb   : > { %1512 = vst [vmem:[%s3073_s13 + $0x30] sm:$0xff] %v1448_v59  ;;  %v1382_v5 = vsub.f32 2.0, %v1350_v34 }
 0x1bc   : > { %1513 = vst [vmem:[%s3073_s13 + $0x38] sm:$0xff] %v1449_v44  ;;  %v1416_v28 = vmul.f32 %v2013_v4, %v1384_v55 }
 0x1bd   : > { %1297 = vadd.xlane.f32.xlu2 %v1296_v30  ;;  %v1414_v3 = vmul.f32 %v2015_v51, %v1382_v5 }
 0x1be   : > { %v1454_v14 = vmul.f32 %v2753_v60, %v1416_v28  ;;  %v1455_v57 = vmul.f32 %v2758_v47, %v1416_v28 }
 0x1bf   : > { %v2017_v21 = vpop.eup %2016  ;;  %v1450_v50 = vmul.f32 %v2763_v26, %v1414_v3  ;;  %v1451_v13 = vmul.f32 %v2766_v48, %v1414_v3 }
 0x1c0   : > { %v2019_v56 = vpop.eup %2018  ;;  %1518 = vst [vmem:[%s3073_s13 + $0x60] sm:$0xff] %v1454_v14  ;;  %v1355_v9 = vmul.f32 %v2017_v21, %v1247_v7  ;;  %v1256_v36 = vpop.xlane.xlu0 %1255 }
 0x1c1   : > { %v1250_v25 = vpop.xlane.xlu1 %1249  ;;  %1519 = vst [vmem:[%s3073_s13 + $0x68] sm:$0xff] %v1455_v57  ;;  %v1353_v59 = vmul.f32 %v2019_v56, %v1241_v42  ;;  %2020 = vrcp.f32 %v1256_v36 }
 0x1c2   : > { %1514 = vst [vmem:[%s3073_s13 + $0x40] sm:$0xff] %v1450_v50  ;;  %v1387_v60 = vsub.f32 2.0, %v1355_v9  ;;  %2022 = vrcp.f32 %v1250_v25 }
 0x1c3   : > { %1515 = vst [vmem:[%s3073_s13 + $0x48] sm:$0xff] %v1451_v13  ;;  %v1385_v47 = vsub.f32 2.0, %v1353_v59  ;;  %v3319_v59 = vld [vmem:[#allocation6_spill] sm:$0xff] }
 0x1c4   : > { %v1419_v26 = vmul.f32 %v2017_v21, %v1387_v60  ;;  %v3318_v21 = vld [vmem:[#allocation13_spill] sm:$0xff] }
 0x1c5   : > { %1306 = vadd.xlane.f32.xlu2 %v1305_v49  ;;  %v1417_v48 = vmul.f32 %v2019_v56, %v1385_v47  ;;  %v3320_v47 = vld [vmem:[#allocation7_spill] sm:$0xff] }
 0x1c6   : > { %v1460_v44 = vmul.f32 %v2780_v52, %v1419_v26  ;;  %v1461_v4 = vmul.f32 %v2784_v43, %v1419_v26 }
 0x1c7   : > { %v2021_v51 = vpop.eup %2020  ;;  %v1456_v19 = vmul.f32 %v2789_v39, %v1417_v48  ;;  %v1457_v7 = vmul.f32 %v2794_v31, %v1417_v48 }
 0x1c8   : > { %v2023_v42 = vpop.eup %2022  ;;  %1524 = vst [vmem:[%s3073_s13 + $0x90] sm:$0xff] %v1460_v44  ;;  %v1358_v30 = vmul.f32 %v2021_v51, %v1256_v36  ;;  %v1265_v34 = vpop.xlane.xlu0 %1264  ;;  %v3321_v44 = vld [vmem:[#allocation14_spill] sm:$0xff] }
 0x1c9   : > { %v1259_v55 = vpop.xlane.xlu1 %1258  ;;  %1525 = vst [vmem:[%s3073_s13 + $0x98] sm:$0xff] %v1461_v4  ;;  %v1356_v5 = vmul.f32 %v2023_v42, %v1250_v25  ;;  %2024 = vrcp.f32 %v1265_v34 }
 0x1ca   : > { %1520 = vst [vmem:[%s3073_s13 + $0x70] sm:$0xff] %v1456_v19  ;;  %v1390_v28 = vsub.f32 2.0, %v1358_v30  ;;  %2026 = vrcp.f32 %v1259_v55 }
 0x1cb   : > { %1521 = vst [vmem:[%s3073_s13 + $0x78] sm:$0xff] %v1457_v7  ;;  %v1388_v52 = vsub.f32 2.0, %v1356_v5 }
 0x1cc   : > { %v1422_v43 = vmul.f32 %v2021_v51, %v1390_v28  ;;  %v3322_v51 = vld [vmem:[#allocation15_spill] sm:$0xff] }
 0x1cd   : > { %v1420_v39 = vmul.f32 %v2023_v42, %v1388_v52 }
 0x1ce   : > { %v1466_v31 = vmul.f32 %v2814_v38, %v1422_v43  ;;  %v1467_v3 = vmul.f32 %v2818_v12, %v1422_v43 }
 0x1cf   : > { %v2025_v14 = vpop.eup %2024  ;;  %v1462_v57 = vmul.f32 %v2822_v24, %v1420_v39  ;;  %v1463_v50 = vmul.f32 %v3318_v21, %v1420_v39 }
 0x1d0   : > { %v2027_v13 = vpop.eup %2026  ;;  %1530 = vst [vmem:[%s3073_s13 + $0xc0] sm:$0xff] %v1466_v31  ;;  %v1361_v56 = vmul.f32 %v2025_v14, %v1265_v34 }
 0x1d1   : > { %v1274_v9 = vpop.xlane.xlu0 %1273  ;;  %1531 = vst [vmem:[%s3073_s13 + $0xc8] sm:$0xff] %v1467_v3  ;;  %v1359_v25 = vmul.f32 %v2027_v13, %v1259_v55 }
 0x1d2   : > { %v1268_v36 = vpop.xlane.xlu1 %1267  ;;  %2028 = vrcp.f32 %v1274_v9  ;;  %1526 = vst [vmem:[%s3073_s13 + $0xa0] sm:$0xff] %v1462_v57  ;;  %v1393_v38 = vsub.f32 2.0, %v1361_v56 }
 0x1d3   : > { %2030 = vrcp.f32 %v1268_v36  ;;  %1527 = vst [vmem:[%s3073_s13 + $0xa8] sm:$0xff] %v1463_v50  ;;  %v1391_v12 = vsub.f32 2.0, %v1359_v25 }
 0x1d4   : > { %v1425_v49 = vmul.f32 %v2025_v14, %v1393_v38 }
 0x1d5   : > { %v1423_v24 = vmul.f32 %v2027_v13, %v1391_v12 }
 0x1d6   : > { %v1472_v60 = vmul.f32 %v3319_v59, %v1425_v49  ;;  %v1473_v26 = vmul.f32 %v3320_v47, %v1425_v49 }
 0x1d7   : > { %v1468_v4 = vmul.f32 %v3321_v44, %v1423_v24  ;;  %v1469_v19 = vmul.f32 %v3322_v51, %v1423_v24 }
 0x1d8   : > { %v2029_v48 = vpop.eup %2028  ;;  %1536 = vst [vmem:[%s3073_s13 + $0xf0] sm:$0xff] %v1472_v60 }
 0x1d9   : > { %v2031_v7 = vpop.eup %2030  ;;  %v1364_v42 = vmul.f32 %v2029_v48, %v1274_v9  ;;  %1537 = vst [vmem:[%s3073_s13 + $0xf8] sm:$0xff] %v1473_v26 }
 0x1da   : > { %v1277_v30 = vpop.xlane.xlu1 %1276  ;;  %v1362_v34 = vmul.f32 %v2031_v7, %v1268_v36  ;;  %1532 = vst [vmem:[%s3073_s13 + $0xd0] sm:$0xff] %v1468_v4 }
 0x1db   : > { %2032 = vrcp.f32 %v1277_v30  ;;  %v1396_v55 = vsub.f32 2.0, %v1364_v42  ;;  %1533 = vst [vmem:[%s3073_s13 + $0xd8] sm:$0xff] %v1469_v19 }
 0x1dc   : > { %v1394_v5 = vsub.f32 2.0, %v1362_v34 }
 0x1dd   : > { %v1428_v28 = vmul.f32 %v2029_v48, %v1396_v55 }
 0x1de   : > { %v1426_v52 = vmul.f32 %v2031_v7, %v1394_v5 }
 0x1df   : > { %v1478_v43 = vmul.f32 %v2888_v35, %v1428_v28  ;;  %v1479_v39 = vmul.f32 %v2900_v8, %v1428_v28 }
 0x1e0   : > { %v1474_v3 = vmul.f32 %v2880_v11, %v1426_v52  ;;  %v1475_v14 = vmul.f32 %v2886_v18, %v1426_v52 }
 0x1e1   : > { %v2033_v31 = vpop.eup %2032  ;;  %1542 = vst [vmem:[%s3073_s13 + $0x120] sm:$0xff] %v1478_v43 }
 0x1e2   : > { %v1365_v57 = vmul.f32 %v2033_v31, %v1277_v30  ;;  %v1286_v21 = vpop.xlane.xlu1 %1285  ;;  %1543 = vst [vmem:[%s3073_s13 + $0x128] sm:$0xff] %v1479_v39 }
 0x1e3   : > { %2034 = vrcp.f32 %v1286_v21  ;;  %1538 = vst [vmem:[%s3073_s13 + $0x100] sm:$0xff] %v1474_v3 }
 0x1e4   : > { %v1397_v50 = vsub.f32 2.0, %v1365_v57  ;;  %1539 = vst [vmem:[%s3073_s13 + $0x108] sm:$0xff] %v1475_v14 }
 0x1e6   : > { %v1429_v13 = vmul.f32 %v2033_v31, %v1397_v50 }
 0x1e8   : > { %v1480_v35 = vmul.f32 %v2931_v61, %v1429_v13  ;;  %v1481_v8 = vmul.f32 %v2940_v32, %v1429_v13 }
 0x1e9   : > { %v2035_v56 = vpop.eup %2034 }
 0x1ea   : > { %1544 = vst [vmem:[%s3073_s13 + $0x130] sm:$0xff] %v1480_v35  ;;  %v1368_v11 = vmul.f32 %v2035_v56, %v1286_v21  ;;  %v1295_v18 = vpop.xlane.xlu1 %1294 }
 0x1eb   : > { %1545 = vst [vmem:[%s3073_s13 + $0x138] sm:$0xff] %v1481_v8  ;;  %2036 = vrcp.f32 %v1295_v18 }
 0x1ec   : > { %v1400_v9 = vsub.f32 2.0, %v1368_v11 }
 0x1ee   : > { %v1432_v36 = vmul.f32 %v2035_v56, %v1400_v9 }
 0x1f0   : > { %v1283_v25 = vpop.xlane.xlu0 %1282  ;;  %v1486_v38 = vmul.f32 %v2952_v10, %v1432_v36  ;;  %v1487_v12 = vmul.f32 %v2960_v29, %v1432_v36 }
 0x1f1   : > { %2038 = vrcp.f32 %v1283_v25  ;;  %v2037_v49 = vpop.eup %2036 }
 0x1f2   : > { %1550 = vst [vmem:[%s3073_s13 + $0x160] sm:$0xff] %v1486_v38  ;;  %v1371_v61 = vmul.f32 %v2037_v49, %v1295_v18  ;;  %v1304_v32 = vpop.xlane.xlu1 %1303  ;;  %v415_v38 = vld [vmem:[%s366_s17] sm:$0xff] }
 0x1f3   : > { %1551 = vst [vmem:[%s3073_s13 + $0x168] sm:$0xff] %v1487_v12  ;;  %2040 = vrcp.f32 %v1304_v32 }
 0x1f4   : > { %v1403_v24 = vsub.f32 2.0, %v1371_v61  ;;  %v3323_v61 = vld [vmem:[#allocation18_spill] sm:$0xff]  ;;  %1586 = vst [vmem:[#allocation1] ss:$2 sm:$0xff] %v415_v38  ;;  %v3331_v38 = vld [vmem:[#allocation24_spill] sm:$0xff] }
 0x1f6   : > { %v1435_v60 = vmul.f32 %v2037_v49, %v1403_v24  ;;  %v3324_v24 = vld [vmem:[#allocation20_spill] sm:$0xff] }
 0x1f7   : > { %v2039_v59 = vpop.eup %2038 }
 0x1f8   : > { %v1367_v47 = vmul.f32 %v2039_v59, %v1283_v25  ;;  %v1292_v26 = vpop.xlane.xlu0 %1291  ;;  %v1235_v48 = vpop.xlane.xlu2 %1234  ;;  %v1492_v44 = vmul.f32 %v2905_v15, %v1435_v60  ;;  %v1493_v10 = vmul.f32 %v2927_v58, %v1435_v60  ;;  %v3325_v60 = vld [vmem:[#allocation21_spill] sm:$0xff] }
 0x1f9   : > { %2042 = vrcp.f32 %v1292_v26  ;;  %v2041_v29 = vpop.eup %2040 }
 0x1fa   : > { %v1399_v4 = vsub.f32 2.0, %v1367_v47  ;;  %2044 = vrcp.f32 %v1235_v48  ;;  %1556 = vst [vmem:[%s3073_s13 + $0x190] sm:$0xff] %v1492_v44  ;;  %v1374_v51 = vmul.f32 %v2041_v29, %v1304_v32 }
 0x1fb   : > { %v1313_v19 = vpop.xlane.xlu1 %1312  ;;  %1557 = vst [vmem:[%s3073_s13 + $0x198] sm:$0xff] %v1493_v10 }
 0x1fc   : > { %v1431_v7 = vmul.f32 %v2039_v59, %v1399_v4  ;;  %2046 = vrcp.f32 %v1313_v19  ;;  %v1406_v42 = vsub.f32 2.0, %v1374_v51 }
 0x1fe   : > { %v1484_v30 = vmul.f32 %v2998_v22, %v1431_v7  ;;  %v1485_v34 = vmul.f32 %v3000_v17, %v1431_v7  ;;  %v1438_v58 = vmul.f32 %v2041_v29, %v1406_v42 }
 0x1ff   : > { %v2043_v15 = vpop.eup %2042 }
 0x200   : > { %v2045_v55 = vpop.eup %2044  ;;  %1548 = vst [vmem:[%s3073_s13 + $0x150] sm:$0xff] %v1484_v30  ;;  %v1370_v5 = vmul.f32 %v2043_v15, %v1292_v26  ;;  %v1301_v28 = vpop.xlane.xlu0 %1300  ;;  %v1498_v43 = vmul.f32 %v2851_v46, %v1438_v58  ;;  %v1499_v39 = vmul.f32 %v2854_v54, %v1438_v58  ;;  %v3326_v30 = vld [vmem:[#allocation12_spill] sm:$0xff] }
 0x201   : > { %v1244_v52 = vpop.xlane.xlu2 %1243  ;;  %1549 = vst [vmem:[%s3073_s13 + $0x158] sm:$0xff] %v1485_v34  ;;  %v1351_v31 = vmul.f32 %v2045_v55, %v1235_v48  ;;  %2048 = vrcp.f32 %v1301_v28 }
 0x202   : > { %v2047_v22 = vpop.eup %2046  ;;  %v1402_v3 = vsub.f32 2.0, %v1370_v5  ;;  %2050 = vrcp.f32 %v1244_v52  ;;  %1562 = vst [vmem:[%s3073_s13 + $0x1c0] sm:$0xff] %v1498_v43 }
 0x203   : > { %v1383_v17 = vsub.f32 2.0, %v1351_v31  ;;  %v1377_v14 = vmul.f32 %v2047_v22, %v1313_v19  ;;  %1563 = vst [vmem:[%s3073_s13 + $0x1c8] sm:$0xff] %v1499_v39 }
 0x204   : > { %v1434_v57 = vmul.f32 %v2043_v15, %v1402_v3 }
 0x205   : > { %v1415_v21 = vmul.f32 %v2045_v55, %v1383_v17  ;;  %v1409_v50 = vsub.f32 2.0, %v1377_v14 }
 0x206   : > { %v1490_v46 = vmul.f32 %v2954_v2, %v1434_v57  ;;  %v1491_v54 = vmul.f32 %v2956_v6, %v1434_v57  ;;  %v3329_v57 = vld [vmem:[#allocation17_spill] sm:$0xff] }
 0x207   : > { %v2049_v13 = vpop.eup %2048  ;;  %v1452_v35 = vmul.f32 %v3020_v23, %v1415_v21  ;;  %v1453_v8 = vmul.f32 %v3022_v53, %v1415_v21  ;;  %v1441_v56 = vmul.f32 %v2047_v22, %v1409_v50 }
 0x208   : > { %v2051_v11 = vpop.eup %2050  ;;  %1554 = vst [vmem:[%s3073_s13 + $0x180] sm:$0xff] %v1490_v46  ;;  %v1373_v18 = vmul.f32 %v2049_v13, %v1301_v28  ;;  %v1310_v9 = vpop.xlane.xlu0 %1309  ;;  %v3327_v28 = vld [vmem:[#allocation19_spill] sm:$0xff] }
 0x209   : > { %v1253_v36 = vpop.xlane.xlu2 %1252  ;;  %1555 = vst [vmem:[%s3073_s13 + $0x188] sm:$0xff] %v1491_v54  ;;  %v1504_v2 = vmul.f32 %v2650_v62, %v1441_v56  ;;  %v1505_v6 = vmul.f32 %v2652_v63, %v1441_v56  ;;  %v1354_v23 = vmul.f32 %v2051_v11, %v1244_v52  ;;  %2052 = vrcp.f32 %v1310_v9 }
 0x20a   : > { %1516 = vst [vmem:[%s3073_s13 + $0x50] sm:$0xff] %v1452_v35  ;;  %v1405_v53 = vsub.f32 2.0, %v1373_v18  ;;  %2054 = vrcp.f32 %v1253_v36  ;;  %v1578_v18 = vstv %s379_s18 }
 0x20b   : > { %1517 = vst [vmem:[%s3073_s13 + $0x58] sm:$0xff] %v1453_v8  ;;  %v1386_v25 = vsub.f32 2.0, %v1354_v23 }
 0x20c   : > { %1568 = vst [vmem:[%s3073_s13 + $0x1f0] sm:$0xff] %v1504_v2  ;;  %v1437_v12 = vmul.f32 %v2049_v13, %v1405_v53  ;;  %v3330_v53 = vld [vmem:[#allocation23_spill] sm:$0xff] }
 0x20d   : > { %1569 = vst [vmem:[%s3073_s13 + $0x1f8] sm:$0xff] %v1505_v6  ;;  %v1418_v49 = vmul.f32 %v2051_v11, %v1386_v25 }
 0x20e   : > { %v1496_v62 = vmul.f32 %v2892_v41, %v1437_v12  ;;  %v1497_v63 = vmul.f32 %v3323_v61, %v1437_v12 }
 0x20f   : > { %v2053_v32 = vpop.eup %2052  ;;  %v1458_v59 = vmul.f32 %v3324_v24, %v1418_v49  ;;  %v1459_v47 = vmul.f32 %v3325_v60, %v1418_v49 }
 0x210   : > { %v2055_v26 = vpop.eup %2054  ;;  %1560 = vst [vmem:[%s3073_s13 + $0x1b0] sm:$0xff] %v1496_v62  ;;  %v1376_v48 = vmul.f32 %v2053_v32, %v1310_v9 }
 0x211   : > { %v1262_v44 = vpop.xlane.xlu2 %1261  ;;  %1561 = vst [vmem:[%s3073_s13 + $0x1b8] sm:$0xff] %v1497_v63  ;;  %v1357_v10 = vmul.f32 %v2055_v26, %v1253_v36  ;;  %v1588_v63 = vld.sshfl [vmem:[#allocation1 + $0x8] sm:$0xff pattern:$0x75316420] }
 0x212   : > { %2056 = vrcp.f32 %v1262_v44  ;;  %1522 = vst [vmem:[%s3073_s13 + $0x80] sm:$0xff] %v1458_v59  ;;  %v1408_v29 = vsub.f32 2.0, %v1376_v48 }
 0x213   : > { %1523 = vst [vmem:[%s3073_s13 + $0x88] sm:$0xff] %v1459_v47  ;;  %v1389_v41 = vsub.f32 2.0, %v1357_v10  ;;  %v1587_v47 = vld.sshfl [vmem:[#allocation1] sm:$0xff pattern:$0x75316420] }
 0x214   : > { %v1440_v4 = vmul.f32 %v2053_v32, %v1408_v29  ;;  %v1195_v51 = vpop.f32.mrf.mxu2 }
 0x215   : > { %v1421_v19 = vmul.f32 %v2055_v26, %v1389_v41  ;;  %v1215_v7 = vpop.f32.mrf.mxu3 }
 0x216   : > { %v1502_v42 = vmul.f32 %v3314_v0, %v1440_v4  ;;  %v1503_v34 = vmul.f32 %v3326_v30, %v1440_v4  ;;  %v1216_v15 = vadd.f32 %v1215_v7, %v1195_v51  ;;  %v1155_v58 = vpop.f32.mrf.mxu0  ;;  %v3332_v51 = vld [vmem:[#allocation22_spill] sm:$0xff] }
 0x217   : > { %v1464_v5 = vmul.f32 %v2934_v16, %v1421_v19  ;;  %v1465_v52 = vmul.f32 %v3327_v28, %v1421_v19  ;;  %v1175_v43 = vpop.f32.mrf.mxu1  ;;  %v3328_v16 = vld [vmem:[#allocation16_spill] sm:$0xff] }
 0x218   : > { %v2057_v55 = vpop.eup %2056  ;;  %1566 = vst [vmem:[%s3073_s13 + $0x1e0] sm:$0xff] %v1502_v42  ;;  %2058 = vrcp.f32 %v1216_v15  ;;  %v1176_v22 = vadd.f32 %v1175_v43, %v1155_v58 }
 0x219   : > { %v1360_v39 = vmul.f32 %v2057_v55, %v1262_v44  ;;  %v1271_v31 = vpop.xlane.xlu2 %1270  ;;  %1567 = vst [vmem:[%s3073_s13 + $0x1e8] sm:$0xff] %v1503_v34 }
 0x21a   : > { %2060 = vrcp.f32 %v1271_v31  ;;  %1528 = vst [vmem:[%s3073_s13 + $0xb0] sm:$0xff] %v1464_v5 }
 0x21b   : > { %v1392_v0 = vsub.f32 2.0, %v1360_v39  ;;  %2062 = vrcp.f32 %v1176_v22  ;;  %1529 = vst [vmem:[%s3073_s13 + $0xb8] sm:$0xff] %v1465_v52 }
 0x21d   : > { %v1424_v3 = vmul.f32 %v2057_v55, %v1392_v0 }
 0x21e   : > { %v2059_v17 = vpop.eup %2058 }
 0x21f   : > { %v1470_v14 = vmul.f32 %v3328_v16, %v1424_v3  ;;  %v1471_v21 = vmul.f32 %v3329_v57, %v1424_v3  ;;  %v1573_v46 = vmul.f32 %v2059_v17, %v1216_v15 }
 0x220   : > { %v2061_v50 = vpop.eup %2060 }
 0x221   : > { %v2063_v54 = vpop.eup %2062  ;;  %1534 = vst [vmem:[%s3073_s13 + $0xe0] sm:$0xff] %v1470_v14  ;;  %v1363_v13 = vmul.f32 %v2061_v50, %v1271_v31  ;;  %v1280_v35 = vpop.xlane.xlu2 %1279  ;;  %v1575_v8 = vsub.f32 2.0, %v1573_v46 }
 0x222   : > { %1535 = vst [vmem:[%s3073_s13 + $0xe8] sm:$0xff] %v1471_v21  ;;  %v1572_v56 = vmul.f32 %v2063_v54, %v1176_v22  ;;  %2064 = vrcp.f32 %v1280_v35 }
 0x223   : > { %v1395_v11 = vsub.f32 2.0, %v1363_v13  ;;  %v1577_v9 = vmul.f32 %v2059_v17, %v1575_v8 }
 0x224   : > { %v1574_v36 = vsub.f32 2.0, %v1572_v56 }
 0x225   : > { %v1427_v2 = vmul.f32 %v2061_v50, %v1395_v11  ;;  %v1580_v6 = vmul.f32 %v1578_v18, %v1577_v9 }
 0x226   : > { %v1576_v23 = vmul.f32 %v2063_v54, %v1574_v36 }
 0x227   : > { %v1476_v25 = vmul.f32 %v3330_v53, %v1427_v2  ;;  %v1477_v12 = vmul.f32 %v3331_v38, %v1427_v2  ;;  %v1582_v62 = vperm.slane %v1580_v6, 4 }
 0x228   : > { %v2065_v49 = vpop.eup %2064  ;;  %v1579_v61 = vmul.f32 %v1578_v18, %v1576_v23 }
 0x229   : > { %1540 = vst [vmem:[%s3073_s13 + $0x110] sm:$0xff] %v1476_v25  ;;  %v1366_v32 = vmul.f32 %v2065_v49, %v1280_v35  ;;  %v1289_v24 = vpop.xlane.xlu2 %1288  ;;  %v1584_v59 = vmul.f32 %v1582_v62, %v1216_v15 }
 0x22a   : > { %1541 = vst [vmem:[%s3073_s13 + $0x118] sm:$0xff] %v1477_v12  ;;  %v1581_v60 = vperm.slane %v1579_v61, 4  ;;  %2066 = vrcp.f32 %v1289_v24 }
 0x22b   : > { %v1398_v26 = vsub.f32 2.0, %v1366_v32  ;;  %v1592_v48 = vadd.f32 %v1588_v63, %v1584_v59 }
 0x22c   : > { %v1583_v44 = vmul.f32 %v1581_v60, %v1176_v22 }
 0x22d   : > { %v1430_v10 = vmul.f32 %v2065_v49, %v1398_v26  ;;  %v1595_v29 = vrot.slane %v1592_v48, 4 }
 0x22e   : > { %v1591_v41 = vadd.f32 %v1587_v47, %v1583_v44 }
 0x22f   : > { %v1482_v4 = vmul.f32 %v3008_v40, %v1430_v10  ;;  %v1483_v19 = vmul.f32 %v3332_v51, %v1430_v10 }
 0x230   : > { %v2067_v7 = vpop.eup %2066  ;;  %v1597_v42 = vsel %vm1596_vm1, %v1591_v41, %v1595_v29 }
 0x231   : > { %1599 = vst [vmem:[%s376_s21] sm:$0xff] %v1597_v42  ;;  %v1369_v30 = vmul.f32 %v2067_v7, %v1289_v24  ;;  %v1298_v34 = vpop.xlane.xlu2 %1297 }
 0x232   : > { %1546 = vst [vmem:[%s3073_s13 + $0x140] sm:$0xff] %v1482_v4  ;;  %2068 = vrcp.f32 %v1298_v34 }
 0x233   : > { %1547 = vst [vmem:[%s3073_s13 + $0x148] sm:$0xff] %v1483_v19  ;;  %v1401_v15 = vsub.f32 2.0, %v1369_v30 }
 0x235   : > { %v1433_v58 = vmul.f32 %v2067_v7, %v1401_v15 }
 0x237   : > { %v1488_v55 = vmul.f32 %v2964_v45, %v1433_v58  ;;  %v1489_v5 = vmul.f32 %v2972_v20, %v1433_v58 }
 0x238   : > { %v2069_v40 = vpop.eup %2068 }
 0x239   : > { %1552 = vst [vmem:[%s3073_s13 + $0x170] sm:$0xff] %v1488_v55  ;;  %v1372_v28 = vmul.f32 %v2069_v40, %v1298_v34  ;;  %v1307_v52 = vpop.xlane.xlu2 %1306 }
 0x23a   : > { %1553 = vst [vmem:[%s3073_s13 + $0x178] sm:$0xff] %v1489_v5  ;;  %2070 = vrcp.f32 %v1307_v52 }
 0x23b   : > { %v1404_v43 = vsub.f32 2.0, %v1372_v28 }
 0x23d   : > { %v1436_v39 = vmul.f32 %v2069_v40, %v1404_v43 }
 0x23f   : > { %v1494_v31 = vmul.f32 %v2909_v27, %v1436_v39  ;;  %v1495_v22 = vmul.f32 %v2918_v1, %v1436_v39 }
 0x240   : > { %v2071_v45 = vpop.eup %2070 }
 0x241   : > { %1558 = vst [vmem:[%s3073_s13 + $0x1a0] sm:$0xff] %v1494_v31  ;;  %v1375_v20 = vmul.f32 %v2071_v45, %v1307_v52 }
 0x242   : > { %1559 = vst [vmem:[%s3073_s13 + $0x1a8] sm:$0xff] %v1495_v22 }
 0x243   : > { %v1407_v0 = vsub.f32 2.0, %v1375_v20 }
 0x245   : > { %v1439_v3 = vmul.f32 %v2071_v45, %v1407_v0 }
 0x247   : > { %v1500_v17 = vmul.f32 %v2830_v33, %v1439_v3  ;;  %v1501_v27 = vmul.f32 %v2838_v37, %v1439_v3 }
 0x249   : > { %1564 = vst [vmem:[%s3073_s13 + $0x1d0] sm:$0xff] %v1500_v17 }
 0x24a   : > { %1565 = vst [vmem:[%s3073_s13 + $0x1d8] sm:$0xff] %v1501_v27 }
 0x24b   : > { %2099 = shalt.err (!%p2096_p5)
}
 0x24c   : > { %s2153_s7 = smov 256   ;;  %s2154_s13 = smov 16  }
 0x24d   : > { %1815 = dma.vmem_to_hbm [thread:$0]  (%p2233_p4), %s1630_s9, 8192, %s1632_s14, %s1610_s26, %s2153_s7, %s2153_s7, %s2154_s13  }
 0x24e PF: > { %p1821_p6 = scmp.ge.s32.totalorder %s2150_s28, 2  ;;  %s1658_s12 = sand.u32 1, %s2130_s23  }
 0x24f   : > { %s1659_s22 = scalar_lea.sflag [#allocation4], %s1658_s12 }
 0x250   : > { %p1818_p7 = pnand %p1821_p6, %p2240_p8 }
 0x252   : > { %p1819_p9 = pneg %p1818_p7 }
 0x254   : > { %2125 = dma.done.wait (%p1819_p9), %s1659_s22, 8192  }
 0x255   : > { %2127 = vsyncadd (%p1819_p9), %s1659_s22, 4294959104  ;;  %s21_s28 = sadd.s32 1, %s2150_s28   ;;  %s3333_s23 = smov %s2134_s24 }
 0x256   : > { %p18_p10 = scmp.ge.s32.totalorder %s21_s28, 4   ;;  %s3334_s24 = smov %s2138_s25 }
 0x257   : > { %s3335_s25 = smov %s2246_s11  ;;  %s3336_s26 = smov %s2146_s27 }
 0x258   : > { %s3337_s27 = smov %s3339_s30  ;;  %20 = sbr.rel (!%p18_p10) target bundleno = 6 (0x6), region = 96 }
 0x25d   :  { %1665 = vsyncpa [#allocation4], 1 }
 0x25e   :  { %1667 = vsyncpa [#allocation4 + $0x1], 1 }

</bundles_post_ra>
